<compile_context>
chip_gen: v5e
topology: v5e:2x2
jax: 0.10.0
libtpu: 0.0.40
codegen_flags: <defaults>
</compile_context>

<pallas_src>
import functools

import jax
import jax.numpy as jnp
from jax.experimental import pallas as pl
from jax.experimental.pallas import tpu as pltpu

LANE = 128


def _round_up(x, m):
    return (x + m - 1) // m * m


def _largest_div_tile(n, cap, step=LANE):
    """Largest multiple of `step` dividing n (n already a multiple of `step`), capped."""
    t = min(cap, (n // step) * step)
    while n % t:
        t -= step
    return t


def _plan_tiles(v, tm_cap=2048, tk_cap=1024):
    """Padded extent + (tm, tk).  For v > tm_cap pad to a 512 grain so the divisor
    search cannot fall back to 128-wide tiles (the ~3x perf cliff from the review)."""
    vp = _round_up(v, LANE)
    if vp > tm_cap:
        vp = _round_up(v, 4 * LANE)          # 512 grain
    tm = _largest_div_tile(vp, tm_cap)
    tk = _largest_div_tile(vp, tk_cap)
    return vp, tm, tk


# ----------------------------------------------------------------------------
# Pallas kernels
# ----------------------------------------------------------------------------

def _gcn1_kernel(adj_ref, w1_ref, b1_ref, w2_ref, h1_ref, s2_ref):
    """h1 = adj @ W1 + b1 ; s2 = (h1 @ W2) -> bf16, fused in the reduction epilogue.

    adj_ref / w1_ref are bf16; h1_ref (f32 output block) is the accumulator.
    """
    k = pl.program_id(1)

    @pl.when(k == 0)
    def _():
        h1_ref[...] = jnp.zeros_like(h1_ref)

    h1_ref[...] += jnp.dot(adj_ref[...], w1_ref[...],
                           preferred_element_type=jnp.float32)

    @pl.when(k == pl.num_programs(1) - 1)
    def _():
        h1 = h1_ref[...] + b1_ref[...]
        h1_ref[...] = h1
        s2_ref[...] = jnp.dot(h1, w2_ref[...],
                              preferred_element_type=jnp.float32
                              ).astype(s2_ref.dtype)


def _gcn2_kernel(adj_ref, s2_ref, b2_ref, h1_ref, out_ref):
    """out = 0.5 * h1 + 0.5 * (adj @ s2 + b2).

    adj_ref / s2_ref are bf16; out_ref (f32 output block) is the accumulator.
    """
    k = pl.program_id(1)

    @pl.when(k == 0)
    def _():
        out_ref[...] = jnp.zeros_like(out_ref)

    out_ref[...] += jnp.dot(adj_ref[...], s2_ref[...],
                            preferred_element_type=jnp.float32)

    @pl.when(k == pl.num_programs(1) - 1)
    def _():
        h2 = out_ref[...] + b2_ref[...]
        out_ref[...] = 0.5 * (h1_ref[...] + h2)


def _lgc_forward_padded(adj, w1, b1, w2, b2, *, tm, tk):
    """Padded forward.

    adj [Vp,Vp] bf16, w1 [Vp,Dp] bf16, b1/b2 [1,Dp] f32, w2 [Dp,Dp] f32 -> [Vp,Dp] f32.
    """
    Vp = adj.shape[0]
    Dp = w1.shape[1]
    grid = (Vp // tm, Vp // tk)
    params = pltpu.CompilerParams(
        dimension_semantics=("parallel", "arbitrary"),
        vmem_limit_bytes=32 * 1024 * 1024)

    h1, s2 = pl.pallas_call(
        _gcn1_kernel,
        out_shape=(jax.ShapeDtypeStruct((Vp, Dp), jnp.float32),
                   jax.ShapeDtypeStruct((Vp, Dp), jnp.bfloat16)),
        grid_spec=pltpu.PrefetchScalarGridSpec(
            num_scalar_prefetch=0,
            grid=grid,
            in_specs=[
                pl.BlockSpec((tm, tk), lambda i, k: (i, k)),   # adj tile   (bf16)
                pl.BlockSpec((tk, Dp), lambda i, k: (k, 0)),   # W1 strip   (bf16)
                pl.BlockSpec((1, Dp), lambda i, k: (0, 0)),    # b1         (f32)
                pl.BlockSpec((Dp, Dp), lambda i, k: (0, 0)),   # W2 resident(f32)
            ],
            out_specs=[
                pl.BlockSpec((tm, Dp), lambda i, k: (i, 0)),   # h1 (f32, accumulator)
                pl.BlockSpec((tm, Dp), lambda i, k: (i, 0)),   # s2 = h1 @ W2 (bf16)
            ],
        ),
        compiler_params=params,
    )(adj, w1, b1, w2)

    out = pl.pallas_call(
        _gcn2_kernel,
        out_shape=jax.ShapeDtypeStruct((Vp, Dp), jnp.float32),
        grid_spec=pltpu.PrefetchScalarGridSpec(
            num_scalar_prefetch=0,
            grid=grid,
            in_specs=[
                pl.BlockSpec((tm, tk), lambda i, k: (i, k)),   # adj tile   (bf16)
                pl.BlockSpec((tk, Dp), lambda i, k: (k, 0)),   # s2 strip   (bf16)
                pl.BlockSpec((1, Dp), lambda i, k: (0, 0)),    # b2         (f32)
                pl.BlockSpec((tm, Dp), lambda i, k: (i, 0)),   # h1 row tile(f32)
            ],
            out_specs=pl.BlockSpec((tm, Dp), lambda i, k: (i, 0)),  # out (f32, accumulator)
        ),
        compiler_params=params,
    )(adj, s2, b2, h1)
    return out


# ----------------------------------------------------------------------------
# Model wrapper
# ----------------------------------------------------------------------------

class LGCPallas:
    def __init__(self, vocab_size, emb_dim, adj, key):
        self.vocab_size = vocab_size
        self.emb_dim = emb_dim

        # --- adjacency preprocessing (init-time, matches LGC.normalize) -----
        adj = jnp.asarray(adj, jnp.float32) + jnp.eye(vocab_size, dtype=jnp.float32)
        rowsum = adj.sum(1)
        r_inv = jnp.where(rowsum > 0, 1.0 / rowsum, 0.0)
        adj_norm = adj * r_inv[:, None]            # D^{-1} (A + I)
        self.adj_norm = adj_norm                   # f32 copy for reference checks

        # --- GraphConvolution parameters (Kipf init: U(-1/sqrt(out), 1/sqrt(out)))
        k1w, k1b, k2w, k2b = jax.random.split(key, 4)
        stdv = 1.0 / jnp.sqrt(jnp.float32(emb_dim))
        self.W1 = jax.random.uniform(k1w, (vocab_size, emb_dim), jnp.float32, -stdv, stdv)
        self.b1 = jax.random.uniform(k1b, (emb_dim,), jnp.float32, -stdv, stdv)
        self.W2 = jax.random.uniform(k2w, (emb_dim, emb_dim), jnp.float32, -stdv, stdv)
        self.b2 = jax.random.uniform(k2b, (emb_dim,), jnp.float32, -stdv, stdv)

        # --- pad to TPU-friendly shapes; adj/W1 stored bf16 (bandwidth), rest f32 ---
        Vp, tm, tk = _plan_tiles(vocab_size)
        Dp = _round_up(emb_dim, LANE)
        self.Vp, self.Dp, self.tm, self.tk = Vp, Dp, tm, tk

        self.adj_pad = (jnp.zeros((Vp, Vp), jnp.float32)
                        .at[:vocab_size, :vocab_size].set(adj_norm)
                        .astype(jnp.bfloat16))
        self.W1_pad = (jnp.zeros((Vp, Dp), jnp.float32)
                       .at[:vocab_size, :emb_dim].set(self.W1)
                       .astype(jnp.bfloat16))
        self.b1_pad = jnp.zeros((1, Dp), jnp.float32).at[0, :emb_dim].set(self.b1)
        self.W2_pad = jnp.zeros((Dp, Dp), jnp.float32).at[:emb_dim, :emb_dim].set(self.W2)
        self.b2_pad = jnp.zeros((1, Dp), jnp.float32).at[0, :emb_dim].set(self.b2)

        self._forward = jax.jit(
            functools.partial(_lgc_forward_padded, tm=self.tm, tk=self.tk))

    def forward(self):
        out_pad = self._forward(self.adj_pad, self.W1_pad, self.b1_pad,
                                self.W2_pad, self.b2_pad)
        return out_pad[:self.vocab_size, :self.emb_dim]


# ----------------------------------------------------------------------------
# Demo
# ----------------------------------------------------------------------------

if __name__ == "__main__":
    key = jax.random.PRNGKey(0)
    k_adj, k_model = jax.random.split(key)

    vocab_size = 200      # not a multiple of 128 -> exercises the padding path
    emb_dim = 32          # padded to 128 lanes internally

    # Deterministic symmetric 0/1 adjacency, no self loops (added by the model).
    a = (jax.random.uniform(k_adj, (vocab_size, vocab_size)) > 0.9).astype(jnp.float32)
    a = jnp.maximum(a, a.T)
    a = a * (1.0 - jnp.eye(vocab_size, dtype=jnp.float32))

    model = LGCPallas(vocab_size, emb_dim, a, k_model)

    node_embedding = model.forward()
    node_embedding = jax.block_until_ready(node_embedding)

    # Pure-JAX f32 reference of the same math (x = I kept explicit, like the module).
    def ref_forward():
        x = jnp.eye(vocab_size, dtype=jnp.float32)
        h1 = model.adj_norm @ (x @ model.W1) + model.b1
        h2 = model.adj_norm @ (h1 @ model.W2) + model.b2
        return 0.5 * h1 + 0.5 * h2

    ref = ref_forward()
    assert node_embedding.shape == (vocab_size, emb_dim)
    # Tolerance loosened vs the pure-f32 version: adj / W1 / s2 are streamed in
    # bfloat16 (deliberate bandwidth/precision tradeoff); accumulation stays f32.
    assert jnp.allclose(node_embedding, ref, atol=1e-2, rtol=1e-2)

    print("KERNEL_OK")
</pallas_src>

<mosaic_0001>
module attributes {stable_mosaic.version = 11 : i64} {
  func.func @_gcn2_kernel(%arg0: i32, %arg1: i32, %arg2: memref<256x256xbf16, #tpu.memory_space<vmem>>, %arg3: memref<256x128xbf16, #tpu.memory_space<vmem>>, %arg4: memref<1x128xf32, #tpu.memory_space<vmem>>, %arg5: memref<256x128xf32, #tpu.memory_space<vmem>>, %arg6: memref<256x128xf32, #tpu.memory_space<vmem>>) attributes {dimension_semantics = [#tpu.dimension_semantics<parallel>, #tpu.dimension_semantics<arbitrary>], iteration_bounds = array<i64: 1, 1>, scalar_prefetch = 0 : i64, scratch_operands = 0 : i64, tpu.core_type = #tpu.core_type<tc>, window_params = [{transform_indices = @transform_0, window_bounds = array<i64: 256, 256>}, {transform_indices = @transform_1, window_bounds = array<i64: 256, 128>}, {pipeline_mode = #tpu.pipeline_mode<synchronous>, transform_indices = @transform_2, window_bounds = array<i64: 1, 128>}, {transform_indices = @transform_3, window_bounds = array<i64: 256, 128>}, {transform_indices = @transform_4, window_bounds = array<i64: 256, 128>}]} {
    %c0_i32 = arith.constant 0 : i32
    %0 = arith.cmpi eq, %arg1, %c0_i32 : i32
    %1 = arith.extui %0 : i1 to i32
    %c0_i32_0 = arith.constant 0 : i32
    %2 = arith.cmpi ne, %1, %c0_i32_0 : i32
    scf.if %2 {
      %cst_10 = arith.constant 0.000000e+00 : f32
      %12 = vector.broadcast %cst_10 : f32 to vector<256x128xf32>
      %c0_11 = arith.constant 0 : index
      %c0_12 = arith.constant 0 : index
      %13 = vector.load %arg6[%c0_11, %c0_12] : memref<256x128xf32, #tpu.memory_space<vmem>>, vector<256x128xf32>
      tpu.vector_store %arg6[%c0_11, %c0_12], %12 {strides = array<i32>} : memref<256x128xf32, #tpu.memory_space<vmem>>, vector<256x128xf32>,
    } else {
    }
    %c0 = arith.constant 0 : index
    %c0_1 = arith.constant 0 : index
    %3 = vector.load %arg6[%c0, %c0_1] : memref<256x128xf32, #tpu.memory_space<vmem>>, vector<256x128xf32>
    %c0_2 = arith.constant 0 : index
    %c0_3 = arith.constant 0 : index
    %4 = vector.load %arg2[%c0_2, %c0_3] : memref<256x256xbf16, #tpu.memory_space<vmem>>, vector<256x256xbf16>
    %c0_4 = arith.constant 0 : index
    %c0_5 = arith.constant 0 : index
    %5 = vector.load %arg3[%c0_4, %c0_5] : memref<256x128xbf16, #tpu.memory_space<vmem>>, vector<256x128xbf16>
    %cst = arith.constant dense<0.000000e+00> : vector<256x128xf32>
    %6 = tpu.matmul %4, %5, %cst {dimension_numbers = #tpu.dot_dimension_numbers<[1], [0], [0], [1], [0, 0, 1, 1], [], []>} : vector<256x256xbf16>, vector<256x128xbf16>, vector<256x128xf32> -> vector<256x128xf32>
    %7 = arith.addf %3, %6 : vector<256x128xf32>
    %c0_6 = arith.constant 0 : index
    %c0_7 = arith.constant 0 : index
    %8 = vector.load %arg6[%c0_6, %c0_7] : memref<256x128xf32, #tpu.memory_space<vmem>>, vector<256x128xf32>
    tpu.vector_store %arg6[%c0_6, %c0_7], %7 {strides = array<i32>} : memref<256x128xf32, #tpu.memory_space<vmem>>, vector<256x128xf32>,
    %c0_i32_8 = arith.constant 0 : i32
    %9 = arith.cmpi eq, %arg1, %c0_i32_8 : i32
    %10 = arith.extui %9 : i1 to i32
    %c0_i32_9 = arith.constant 0 : i32
    %11 = arith.cmpi ne, %10, %c0_i32_9 : i32
    scf.if %11 {
      %c0_10 = arith.constant 0 : index
      %c0_11 = arith.constant 0 : index
      %12 = vector.load %arg6[%c0_10, %c0_11] : memref<256x128xf32, #tpu.memory_space<vmem>>, vector<256x128xf32>
      %c0_12 = arith.constant 0 : index
      %c0_13 = arith.constant 0 : index
      %13 = vector.load %arg4[%c0_12, %c0_13] : memref<1x128xf32, #tpu.memory_space<vmem>>, vector<1x128xf32>
      %14 = vector.broadcast %13 : vector<1x128xf32> to vector<256x128xf32>
      %15 = arith.addf %12, %14 : vector<256x128xf32>
      %c0_14 = arith.constant 0 : index
      %c0_15 = arith.constant 0 : index
      %16 = vector.load %arg5[%c0_14, %c0_15] : memref<256x128xf32, #tpu.memory_space<vmem>>, vector<256x128xf32>
      %17 = arith.addf %16, %15 : vector<256x128xf32>
      %cst_16 = arith.constant 5.000000e-01 : f32
      %18 = vector.broadcast %cst_16 : f32 to vector<256x128xf32>
      %19 = arith.mulf %18, %17 : vector<256x128xf32>
      %c0_17 = arith.constant 0 : index
      %c0_18 = arith.constant 0 : index
      %20 = vector.load %arg6[%c0_17, %c0_18] : memref<256x128xf32, #tpu.memory_space<vmem>>, vector<256x128xf32>
      tpu.vector_store %arg6[%c0_17, %c0_18], %19 {strides = array<i32>} : memref<256x128xf32, #tpu.memory_space<vmem>>, vector<256x128xf32>,
    } else {
    }
    return
  }
  func.func @transform_0(%arg0: i32, %arg1: i32) -> (i32, i32) {
    %c0_i32 = arith.constant 0 : i32
    return %arg0, %arg1 : i32, i32
  }
  func.func @transform_1(%arg0: i32, %arg1: i32) -> (i32, i32) {
    %c0_i32 = arith.constant 0 : i32
    %c0_i32_0 = arith.constant 0 : i32
    return %arg1, %c0_i32 : i32, i32
  }
  func.func @transform_2(%arg0: i32, %arg1: i32) -> (i32, i32) {
    %c0_i32 = arith.constant 0 : i32
    %c0_i32_0 = arith.constant 0 : i32
    %c0_i32_1 = arith.constant 0 : i32
    return %c0_i32, %c0_i32_0 : i32, i32
  }
  func.func @transform_3(%arg0: i32, %arg1: i32) -> (i32, i32) {
    %c0_i32 = arith.constant 0 : i32
    %c0_i32_0 = arith.constant 0 : i32
    return %arg0, %c0_i32 : i32, i32
  }
  func.func @transform_4(%arg0: i32, %arg1: i32) -> (i32, i32) {
    %c0_i32 = arith.constant 0 : i32
    %c0_i32_0 = arith.constant 0 : i32
    return %arg0, %c0_i32 : i32, i32
  }
}

module attributes {stable_mosaic.version = 11 : i64} {
  func.func @_gcn1_kernel(%arg0: i32, %arg1: i32, %arg2: memref<256x256xbf16, #tpu.memory_space<vmem>>, %arg3: memref<256x128xbf16, #tpu.memory_space<vmem>>, %arg4: memref<1x128xf32, #tpu.memory_space<vmem>>, %arg5: memref<128x128xf32, #tpu.memory_space<vmem>>, %arg6: memref<256x128xf32, #tpu.memory_space<vmem>>, %arg7: memref<256x128xbf16, #tpu.memory_space<vmem>>) attributes {dimension_semantics = [#tpu.dimension_semantics<parallel>, #tpu.dimension_semantics<arbitrary>], iteration_bounds = array<i64: 1, 1>, scalar_prefetch = 0 : i64, scratch_operands = 0 : i64, tpu.core_type = #tpu.core_type<tc>, window_params = [{transform_indices = @transform_0, window_bounds = array<i64: 256, 256>}, {transform_indices = @transform_1, window_bounds = array<i64: 256, 128>}, {pipeline_mode = #tpu.pipeline_mode<synchronous>, transform_indices = @transform_2, window_bounds = array<i64: 1, 128>}, {pipeline_mode = #tpu.pipeline_mode<synchronous>, transform_indices = @transform_3, window_bounds = array<i64: 128, 128>}, {transform_indices = @transform_4, window_bounds = array<i64: 256, 128>}, {transform_indices = @transform_5, window_bounds = array<i64: 256, 128>}]} {
    %c0_i32 = arith.constant 0 : i32
    %0 = arith.cmpi eq, %arg1, %c0_i32 : i32
    %1 = arith.extui %0 : i1 to i32
    %c0_i32_0 = arith.constant 0 : i32
    %2 = arith.cmpi ne, %1, %c0_i32_0 : i32
    scf.if %2 {
      %cst_10 = arith.constant 0.000000e+00 : f32
      %12 = vector.broadcast %cst_10 : f32 to vector<256x128xf32>
      %c0_11 = arith.constant 0 : index
      %c0_12 = arith.constant 0 : index
      %13 = vector.load %arg6[%c0_11, %c0_12] : memref<256x128xf32, #tpu.memory_space<vmem>>, vector<256x128xf32>
      tpu.vector_store %arg6[%c0_11, %c0_12], %12 {strides = array<i32>} : memref<256x128xf32, #tpu.memory_space<vmem>>, vector<256x128xf32>,
    } else {
    }
    %c0 = arith.constant 0 : index
    %c0_1 = arith.constant 0 : index
    %3 = vector.load %arg6[%c0, %c0_1] : memref<256x128xf32, #tpu.memory_space<vmem>>, vector<256x128xf32>
    %c0_2 = arith.constant 0 : index
    %c0_3 = arith.constant 0 : index
    %4 = vector.load %arg2[%c0_2, %c0_3] : memref<256x256xbf16, #tpu.memory_space<vmem>>, vector<256x256xbf16>
    %c0_4 = arith.constant 0 : index
    %c0_5 = arith.constant 0 : index
    %5 = vector.load %arg3[%c0_4, %c0_5] : memref<256x128xbf16, #tpu.memory_space<vmem>>, vector<256x128xbf16>
    %cst = arith.constant dense<0.000000e+00> : vector<256x128xf32>
    %6 = tpu.matmul %4, %5, %cst {dimension_numbers = #tpu.dot_dimension_numbers<[1], [0], [0], [1], [0, 0, 1, 1], [], []>} : vector<256x256xbf16>, vector<256x128xbf16>, vector<256x128xf32> -> vector<256x128xf32>
    %7 = arith.addf %3, %6 : vector<256x128xf32>
    %c0_6 = arith.constant 0 : index
    %c0_7 = arith.constant 0 : index
    %8 = vector.load %arg6[%c0_6, %c0_7] : memref<256x128xf32, #tpu.memory_space<vmem>>, vector<256x128xf32>
    tpu.vector_store %arg6[%c0_6, %c0_7], %7 {strides = array<i32>} : memref<256x128xf32, #tpu.memory_space<vmem>>, vector<256x128xf32>,
    %c0_i32_8 = arith.constant 0 : i32
    %9 = arith.cmpi eq, %arg1, %c0_i32_8 : i32
    %10 = arith.extui %9 : i1 to i32
    %c0_i32_9 = arith.constant 0 : i32
    %11 = arith.cmpi ne, %10, %c0_i32_9 : i32
    scf.if %11 {
      %c0_10 = arith.constant 0 : index
      %c0_11 = arith.constant 0 : index
      %12 = vector.load %arg6[%c0_10, %c0_11] : memref<256x128xf32, #tpu.memory_space<vmem>>, vector<256x128xf32>
      %c0_12 = arith.constant 0 : index
      %c0_13 = arith.constant 0 : index
      %13 = vector.load %arg4[%c0_12, %c0_13] : memref<1x128xf32, #tpu.memory_space<vmem>>, vector<1x128xf32>
      %14 = vector.broadcast %13 : vector<1x128xf32> to vector<256x128xf32>
      %15 = arith.addf %12, %14 : vector<256x128xf32>
      %c0_14 = arith.constant 0 : index
      %c0_15 = arith.constant 0 : index
      %16 = vector.load %arg6[%c0_14, %c0_15] : memref<256x128xf32, #tpu.memory_space<vmem>>, vector<256x128xf32>
      tpu.vector_store %arg6[%c0_14, %c0_15], %15 {strides = array<i32>} : memref<256x128xf32, #tpu.memory_space<vmem>>, vector<256x128xf32>,
      %c0_16 = arith.constant 0 : index
      %c0_17 = arith.constant 0 : index
      %17 = vector.load %arg5[%c0_16, %c0_17] : memref<128x128xf32, #tpu.memory_space<vmem>>, vector<128x128xf32>
      %cst_18 = arith.constant dense<0.000000e+00> : vector<256x128xf32>
      %18 = tpu.matmul %15, %17, %cst_18 {dimension_numbers = #tpu.dot_dimension_numbers<[1], [0], [0], [1], [0, 0, 1, 1], [], []>} : vector<256x128xf32>, vector<128x128xf32>, vector<256x128xf32> -> vector<256x128xf32>
      %19 = arith.truncf %18 : vector<256x128xf32> to vector<256x128xbf16>
      %c0_19 = arith.constant 0 : index
      %c0_20 = arith.constant 0 : index
      %20 = vector.load %arg7[%c0_19, %c0_20] : memref<256x128xbf16, #tpu.memory_space<vmem>>, vector<256x128xbf16>
      tpu.vector_store %arg7[%c0_19, %c0_20], %19 {strides = array<i32>} : memref<256x128xbf16, #tpu.memory_space<vmem>>, vector<256x128xbf16>,
    } else {
    }
    return
  }
  func.func @transform_0(%arg0: i32, %arg1: i32) -> (i32, i32) {
    %c0_i32 = arith.constant 0 : i32
    return %arg0, %arg1 : i32, i32
  }
  func.func @transform_1(%arg0: i32, %arg1: i32) -> (i32, i32) {
    %c0_i32 = arith.constant 0 : i32
    %c0_i32_0 = arith.constant 0 : i32
    return %arg1, %c0_i32 : i32, i32
  }
  func.func @transform_2(%arg0: i32, %arg1: i32) -> (i32, i32) {
    %c0_i32 = arith.constant 0 : i32
    %c0_i32_0 = arith.constant 0 : i32
    %c0_i32_1 = arith.constant 0 : i32
    return %c0_i32, %c0_i32_0 : i32, i32
  }
  func.func @transform_3(%arg0: i32, %arg1: i32) -> (i32, i32) {
    %c0_i32 = arith.constant 0 : i32
    %c0_i32_0 = arith.constant 0 : i32
    %c0_i32_1 = arith.constant 0 : i32
    return %c0_i32, %c0_i32_0 : i32, i32
  }
  func.func @transform_4(%arg0: i32, %arg1: i32) -> (i32, i32) {
    %c0_i32 = arith.constant 0 : i32
    %c0_i32_0 = arith.constant 0 : i32
    return %arg0, %c0_i32 : i32, i32
  }
  func.func @transform_5(%arg0: i32, %arg1: i32) -> (i32, i32) {
    %c0_i32 = arith.constant 0 : i32
    %c0_i32_0 = arith.constant 0 : i32
    return %arg0, %c0_i32 : i32, i32
  }
}

</mosaic_0001>

<bundles_post_ra>
// kernel: _lgc_forward_padded.3
= control target key start
LH: loop header
LB: loop body
LE: loop exit
PB: predicated region body
PF: predicated region fallthrough
CT: control target
= control target key end

     0   :  { %9 = vsyncpa [#allocation3], 0  ;;  %s1418_s0 = inlined_call_operand.hbm [shape: bf16[256,256], index: 0, kind: input, shape index: {}]   ;;  %s1419_s1 = inlined_call_operand.vmem [shape: bf16[256,128], index: 1, kind: input, shape index: {}]   ;;  %s1420_s2 = inlined_call_operand.vmem [shape: f32[1,128], index: 2, kind: input, shape index: {}]   ;;  %s1421_s3 = inlined_call_operand.vmem [shape: f32[256,128], index: 3, kind: input, shape index: {}]   ;;  %s1422_s4 = inlined_call_operand.hbm [shape: f32[256,128], index: 4, kind: output, shape index: {}]  }
   0x1   :  { %10 = vsyncpa [#allocation4], 0  ;;  %s15_s17 = sshll.u32 %s1418_s0, 4  ;;  %s1196_s18 = smov [#allocation2]   ;;  %s16_s17 = int_to_ptr.hbm [resolvable:$true] %s15_s17 }
   0x2   :  { %s17_s19 = sshll.u32 %s1196_s18, 4  ;;  %s1197_s20 = smov 128   ;;  %s18_s19 = int_to_ptr.vmem [resolvable:$true] %s17_s19 }
   0x3   :  { %s1198_s21 = smov 8  }
   0x4   :  { %23 = dma.hbm_to_vmem [thread:$0]  %s16_s17, 4096, %s18_s19, [#allocation3], %s1197_s20, %s1197_s20, %s1198_s21  }
   0x5   :  { %1192 = dma.done.wait [#allocation3], 4096  }
   0x6   :  { %1193 = vsyncadd [#allocation3], 4294963200  ;;  %v1113_v0 = vld [vmem:[%s1419_s1 + $0x38] sm:$0xff]  ;;  %v1112_v2 = vld [vmem:[%s1419_s1 + $0x30] sm:$0xff]  ;;  %s1199_s12 = smov [#allocation5]   ;;  %s869_s16 = sshll.u32 %s1422_s4, 4  ;;  %s870_s16 = int_to_ptr.hbm [resolvable:$true] %s869_s16 }
   0x7   :  { %v1121_v1 = vld [vmem:[%s1419_s1 + $0x78] sm:$0xff]  ;;  %422 = vmatpush.bf16.msra.mxu0 %v1113_v0  ;;  %1122 = vmatpush.bf16.msra.mxu2 %v1113_v0  ;;  %v1120_v3 = vld [vmem:[%s1419_s1 + $0x70] sm:$0xff]  ;;  %v1111_v4 = vld [vmem:[%s1419_s1 + $0x28] sm:$0xff]  ;;  %s867_s13 = sshll.u32 %s1199_s12, 4  ;;  %s868_s13 = int_to_ptr.vmem [resolvable:$true] %s867_s13 }
   0x8   :  { %511 = vmatpush.bf16.msra.mxu1 %v1121_v1  ;;  %1130 = vmatpush.bf16.msra.mxu3 %v1121_v1  ;;  %v1119_v5 = vld [vmem:[%s1419_s1 + $0x68] sm:$0xff]  ;;  %v1110_v6 = vld [vmem:[%s1419_s1 + $0x20] sm:$0xff]  ;;  %v1109_v8 = vld [vmem:[%s1419_s1 + $0x18] sm:$0xff] }
   0x9   :  { %v1118_v7 = vld [vmem:[%s1419_s1 + $0x60] sm:$0xff]  ;;  %v1117_v9 = vld [vmem:[%s1419_s1 + $0x58] sm:$0xff]  ;;  %v1108_v10 = vld [vmem:[%s1419_s1 + $0x10] sm:$0xff] }
   0xa   :  { %v1116_v11 = vld [vmem:[%s1419_s1 + $0x50] sm:$0xff]  ;;  %v1107_v12 = vld [vmem:[%s1419_s1 + $0x8] sm:$0xff]  ;;  %v1106_v14 = vld [vmem:[%s1419_s1] sm:$0xff] }
   0xb   :  { %423 = vmatpush.bf16.msra.mxu0 %v1112_v2  ;;  %1123 = vmatpush.bf16.msra.mxu2 %v1112_v2  ;;  %v1115_v13 = vld [vmem:[%s1419_s1 + $0x48] sm:$0xff]  ;;  %v1114_v15 = vld [vmem:[%s1419_s1 + $0x40] sm:$0xff]  ;;  %v892_v28 = vld [vmem:[#allocation2 + $0x10] sm:$0xf] }
   0xc   :  { %512 = vmatpush.bf16.msra.mxu1 %v1120_v3  ;;  %1131 = vmatpush.bf16.msra.mxu3 %v1120_v3  ;;  %v884_v16 = vld [vmem:[#allocation2] sm:$0xf]  ;;  %v1075_v17 = vld [vmem:[#allocation2 + $0x4] sm:$0xf0]  ;;  %v1074_v20 = vld [vmem:[#allocation2 + $0x4] sm:$0xf] }
   0xd   :  { %v948_v18 = vld [vmem:[#allocation2 + $0x80] sm:$0xf]  ;;  %v1091_v19 = vld [vmem:[#allocation2 + $0x84] sm:$0xf0]  ;;  %v886_v21 = vld [vmem:[#allocation2 + $0x8] sm:$0xf0]  ;;  %v885_v24 = vor.u32 %v1075_v17, %v884_v16 }
   0xe   :  { %v1090_v22 = vld [vmem:[#allocation2 + $0x84] sm:$0xf]  ;;  %v950_v23 = vld [vmem:[#allocation2 + $0x88] sm:$0xf0]  ;;  %v949_v25 = vor.u32 %v1091_v19, %v948_v18  ;;  %v889_v26 = vor.u32 %v1074_v20, %v886_v21  ;;  %v1077_v29 = vld [vmem:[#allocation2 + $0x14] sm:$0xf0] }
   0xf   :  { %424 = vmatpush.bf16.msra.mxu0 %v1111_v4  ;;  %1124 = vmatpush.bf16.msra.mxu2 %v1111_v4  ;;  %v953_v27 = vor.u32 %v1090_v22, %v950_v23  ;;  %v956_v30 = vld [vmem:[#allocation2 + $0x90] sm:$0xf]  ;;  %v1093_v31 = vld [vmem:[#allocation2 + $0x94] sm:$0xf0]  ;;  %v1076_v32 = vld [vmem:[#allocation2 + $0x14] sm:$0xf]  ;;  %v893_v36 = vor.u32 %v1077_v29, %v892_v28 }
  0x10   :  { %513 = vmatpush.bf16.msra.mxu1 %v1119_v5  ;;  %1132 = vmatpush.bf16.msra.mxu3 %v1119_v5  ;;  %v894_v33 = vld [vmem:[#allocation2 + $0x18] sm:$0xf0]  ;;  %v1092_v34 = vld [vmem:[#allocation2 + $0x94] sm:$0xf]  ;;  %v957_v37 = vor.u32 %v1093_v31, %v956_v30  ;;  %v900_v40 = vld [vmem:[#allocation2 + $0x20] sm:$0xf] }
  0x11   :  { %v958_v35 = vld [vmem:[#allocation2 + $0x98] sm:$0xf0]  ;;  %v897_v38 = vor.u32 %v1076_v32, %v894_v33  ;;  %v1079_v41 = vld [vmem:[#allocation2 + $0x24] sm:$0xf0]  ;;  %v964_v42 = vld [vmem:[#allocation2 + $0xa0] sm:$0xf] }
  0x12   :  { %v961_v39 = vor.u32 %v1092_v34, %v958_v35  ;;  %v1095_v43 = vld [vmem:[#allocation2 + $0xa4] sm:$0xf0]  ;;  %v1078_v44 = vld [vmem:[#allocation2 + $0x24] sm:$0xf]  ;;  %v902_v45 = vld [vmem:[#allocation2 + $0x28] sm:$0xf0]  ;;  %v901_v48 = vor.u32 %v1079_v41, %v900_v40 }
  0x13   :  { %425 = vmatpush.bf16.msra.mxu0 %v1110_v6  ;;  %1125 = vmatpush.bf16.msra.mxu2 %v1110_v6  ;;  %v1094_v46 = vld [vmem:[#allocation2 + $0xa4] sm:$0xf]  ;;  %v966_v47 = vld [vmem:[#allocation2 + $0xa8] sm:$0xf0]  ;;  %v965_v49 = vor.u32 %v1095_v43, %v964_v42  ;;  %v905_v50 = vor.u32 %v1078_v44, %v902_v45  ;;  %v908_v52 = vld [vmem:[#allocation2 + $0x30] sm:$0xf] }
  0x14   :  { %514 = vmatpush.bf16.msra.mxu1 %v1118_v7  ;;  %1133 = vmatpush.bf16.msra.mxu3 %v1118_v7  ;;  %v969_v51 = vor.u32 %v1094_v46, %v966_v47  ;;  %v1081_v53 = vld [vmem:[#allocation2 + $0x34] sm:$0xf0]  ;;  %v972_v54 = vld [vmem:[#allocation2 + $0xb0] sm:$0xf]  ;;  %v1080_v56 = vld [vmem:[#allocation2 + $0x34] sm:$0xf] }
  0x15   :  { %v1097_v55 = vld [vmem:[#allocation2 + $0xb4] sm:$0xf0]  ;;  %v910_v57 = vld [vmem:[#allocation2 + $0x38] sm:$0xf0]  ;;  %v1096_v58 = vld [vmem:[#allocation2 + $0xb4] sm:$0xf]  ;;  %v909_v60 = vor.u32 %v1081_v53, %v908_v52 }
  0x16   :  { %v974_v59 = vld [vmem:[#allocation2 + $0xb8] sm:$0xf0]  ;;  %v973_v61 = vor.u32 %v1097_v55, %v972_v54  ;;  %v913_v62 = vor.u32 %v1080_v56, %v910_v57  ;;  %v916_v0 = vld [vmem:[#allocation2 + $0x40] sm:$0xf]  ;;  %v1083_v1 = vld [vmem:[#allocation2 + $0x44] sm:$0xf0] }
  0x17   :  { %426 = vmatpush.bf16.msra.mxu0 %v1109_v8  ;;  %1126 = vmatpush.bf16.msra.mxu2 %v1109_v8  ;;  %v977_v63 = vor.u32 %v1096_v58, %v974_v59  ;;  %v980_v2 = vld [vmem:[#allocation2 + $0xc0] sm:$0xf]  ;;  %v1099_v3 = vld [vmem:[#allocation2 + $0xc4] sm:$0xf0]  ;;  %v1082_v4 = vld [vmem:[#allocation2 + $0x44] sm:$0xf]  ;;  %v917_v8 = vor.u32 %v1083_v1, %v916_v0 }
  0x18   :  { %515 = vmatpush.bf16.msra.mxu1 %v1117_v9  ;;  %1134 = vmatpush.bf16.msra.mxu3 %v1117_v9  ;;  %v918_v5 = vld [vmem:[#allocation2 + $0x48] sm:$0xf0]  ;;  %v1098_v6 = vld [vmem:[#allocation2 + $0xc4] sm:$0xf]  ;;  %v981_v9 = vor.u32 %v1099_v3, %v980_v2  ;;  %v1084_v16 = vld [vmem:[#allocation2 + $0x54] sm:$0xf] }
  0x19   :  { %v982_v7 = vld [vmem:[#allocation2 + $0xc8] sm:$0xf0]  ;;  %v926_v17 = vld [vmem:[#allocation2 + $0x58] sm:$0xf0]  ;;  %v1100_v18 = vld [vmem:[#allocation2 + $0xd4] sm:$0xf] }
  0x1a   :  { %v990_v19 = vld [vmem:[#allocation2 + $0xd8] sm:$0xf0]  ;;  %v929_v22 = vor.u32 %v1084_v16, %v926_v17  ;;  %v1086_v28 = vld [vmem:[#allocation2 + $0x64] sm:$0xf]  ;;  %v934_v29 = vld [vmem:[#allocation2 + $0x68] sm:$0xf0] }
  0x1b   :  { %427 = vmatpush.bf16.msra.mxu0 %v1108_v10  ;;  %1127 = vmatpush.bf16.msra.mxu2 %v1108_v10  ;;  %v921_v10 = vor.u32 %v1082_v4, %v918_v5  ;;  %v993_v23 = vor.u32 %v1100_v18, %v990_v19  ;;  %v1102_v30 = vld [vmem:[#allocation2 + $0xe4] sm:$0xf]  ;;  %v998_v31 = vld [vmem:[#allocation2 + $0xe8] sm:$0xf0]  ;;  %v937_v34 = vor.u32 %v1086_v28, %v934_v29  ;;  %v1088_v40 = vld [vmem:[#allocation2 + $0x74] sm:$0xf] }
  0x1c   :  { %516 = vmatpush.bf16.msra.mxu1 %v1116_v11  ;;  %1135 = vmatpush.bf16.msra.mxu3 %v1116_v11  ;;  %v985_v11 = vor.u32 %v1098_v6, %v982_v7  ;;  %v1001_v35 = vor.u32 %v1102_v30, %v998_v31  ;;  %v942_v41 = vld [vmem:[#allocation2 + $0x78] sm:$0xf0]  ;;  %v1104_v42 = vld [vmem:[#allocation2 + $0xf4] sm:$0xf]  ;;  %v735_v52 = vld [vmem:[%s1421_s3] sm:$0xff] }
  0x1d   :  { %v1006_v43 = vld [vmem:[#allocation2 + $0xf8] sm:$0xf0]  ;;  %v945_v46 = vor.u32 %v1088_v40, %v942_v41  ;;  %v736_v0 = vld [vmem:[%s1421_s3 + $0x8] sm:$0xff] }
  0x1e   :  { %v1009_v47 = vor.u32 %v1104_v42, %v1006_v43  ;;  %v738_v28 = vld [vmem:[%s1421_s3 + $0x18] sm:$0xff]  ;;  %v739_v42 = vld [vmem:[%s1421_s3 + $0x20] sm:$0xff] }
  0x1f   :  { %428 = vmatpush.bf16.msra.mxu0 %v1107_v12  ;;  %1128 = vmatpush.bf16.msra.mxu2 %v1107_v12  ;;  %v924_v12 = vld [vmem:[#allocation2 + $0x50] sm:$0xf]  ;;  %v754_v40 = vld [vmem:[%s1421_s3 + $0x98] sm:$0xff] }
  0x20   :  { %517 = vmatpush.bf16.msra.mxu1 %v1115_v13  ;;  %1136 = vmatpush.bf16.msra.mxu3 %v1115_v13  ;;  %v1085_v13 = vld [vmem:[#allocation2 + $0x54] sm:$0xf0] }
  0x21   :  { %v925_v20 = vor.u32 %v1085_v13, %v924_v12  ;;  %v752_v12 = vld [vmem:[%s1421_s3 + $0x88] sm:$0xff] }
  0x23   :  { %429 = vmatpush.bf16.msra.mxu0 %v1106_v14  ;;  %1129 = vmatpush.bf16.msra.mxu2 %v1106_v14  ;;  %v988_v14 = vld [vmem:[#allocation2 + $0xd0] sm:$0xf] }
  0x24   :  { %518 = vmatpush.bf16.msra.mxu1 %v1114_v15  ;;  %1137 = vmatpush.bf16.msra.mxu3 %v1114_v15  ;;  %v1101_v15 = vld [vmem:[#allocation2 + $0xd4] sm:$0xf0] }
  0x25   :  { %v989_v21 = vor.u32 %v1101_v15, %v988_v14  ;;  %v737_v14 = vld [vmem:[%s1421_s3 + $0x10] sm:$0xff] }
  0x26   :  { %430 = vmatmul.bf16.vlgmr.msra.gmra.mxu0 %v885_v24  ;;  %470 = vmatmul.bf16.vlgmr.msra.gmra.mxu2 %v949_v25  ;;  %v932_v24 = vld [vmem:[#allocation2 + $0x60] sm:$0xf]  ;;  %v1087_v25 = vld [vmem:[#allocation2 + $0x64] sm:$0xf0] }
  0x27   :  { %519 = vmatmul.bf16.vlgmr.msra.gmra.mxu1 %v889_v26  ;;  %559 = vmatmul.bf16.vlgmr.msra.gmra.mxu3 %v953_v27  ;;  %v996_v26 = vld [vmem:[#allocation2 + $0xe0] sm:$0xf]  ;;  %v1103_v27 = vld [vmem:[#allocation2 + $0xe4] sm:$0xf0]  ;;  %v933_v32 = vor.u32 %v1087_v25, %v932_v24 }
  0x28   :  { %v997_v33 = vor.u32 %v1103_v27, %v996_v26  ;;  %v753_v26 = vld [vmem:[%s1421_s3 + $0x90] sm:$0xff] }
  0x36   :  { %435 = vmatmul.bf16.gmra.mxu0 %v893_v36  ;;  %475 = vmatmul.bf16.gmra.mxu2 %v957_v37  ;;  %v940_v36 = vld [vmem:[#allocation2 + $0x70] sm:$0xf]  ;;  %v1089_v37 = vld [vmem:[#allocation2 + $0x74] sm:$0xf0] }
  0x37   :  { %524 = vmatmul.bf16.gmra.mxu1 %v897_v38  ;;  %564 = vmatmul.bf16.gmra.mxu3 %v961_v39  ;;  %v1004_v38 = vld [vmem:[#allocation2 + $0xf0] sm:$0xf]  ;;  %v1105_v39 = vld [vmem:[#allocation2 + $0xf4] sm:$0xf0]  ;;  %v941_v44 = vor.u32 %v1089_v37, %v940_v36 }
  0x38   :  { %v1005_v45 = vor.u32 %v1105_v39, %v1004_v38 }
  0x46   :  { %440 = vmatmul.bf16.gmra.mxu0 %v901_v48  ;;  %480 = vmatmul.bf16.gmra.mxu2 %v965_v49 }
  0x47   :  { %529 = vmatmul.bf16.gmra.mxu1 %v905_v50  ;;  %569 = vmatmul.bf16.gmra.mxu3 %v969_v51  ;;  %v1282_v51 = vld [vmem:[%s1420_s2] ss:$0 sm:$0xff] }
  0x56   :  { %445 = vmatmul.bf16.gmra.mxu0 %v909_v60  ;;  %485 = vmatmul.bf16.gmra.mxu2 %v973_v61 }
  0x57   :  { %534 = vmatmul.bf16.gmra.mxu1 %v913_v62  ;;  %574 = vmatmul.bf16.gmra.mxu3 %v977_v63  ;;  %v751_v62 = vld [vmem:[%s1421_s3 + $0x80] sm:$0xff] }
  0x66   :  { %450 = vmatmul.bf16.gmra.mxu0 %v917_v8  ;;  %490 = vmatmul.bf16.gmra.mxu2 %v981_v9 }
  0x67   :  { %539 = vmatmul.bf16.gmra.mxu1 %v921_v10  ;;  %579 = vmatmul.bf16.gmra.mxu3 %v985_v11 }
  0x76   :  { %455 = vmatmul.bf16.gmra.mxu0 %v925_v20  ;;  %495 = vmatmul.bf16.gmra.mxu2 %v989_v21 }
  0x77   :  { %544 = vmatmul.bf16.gmra.mxu1 %v929_v22  ;;  %584 = vmatmul.bf16.gmra.mxu3 %v993_v23 }
  0x86   :  { %460 = vmatmul.bf16.gmra.mxu0 %v933_v32  ;;  %500 = vmatmul.bf16.gmra.mxu2 %v997_v33 }
  0x87   :  { %549 = vmatmul.bf16.gmra.mxu1 %v937_v34  ;;  %589 = vmatmul.bf16.gmra.mxu3 %v1001_v35 }
  0x96   :  { %465 = vmatmul.bf16.gmra.mxu0 %v941_v44  ;;  %505 = vmatmul.bf16.gmra.mxu2 %v1005_v45 }
  0x97   :  { %554 = vmatmul.bf16.gmra.mxu1 %v945_v46  ;;  %594 = vmatmul.bf16.gmra.mxu3 %v1009_v47 }
  0xa3   :  { %v431_v48 = vpop.f32.mrf.mxu0 }
  0xa4   :  { %v520_v49 = vpop.f32.mrf.mxu1 }
  0xa5   :  { %v521_v50 = vadd.f32 %v520_v49, %v431_v48 }
  0xa7   :  { %v703_v53 = vadd.f32 %v1282_v51, %v521_v50 }
  0xa9   :  { %v471_v54 = vpop.f32.mrf.mxu2  ;;  %v767_v56 = vadd.f32 %v735_v52, %v703_v53 }
  0xaa   :  { %v560_v55 = vpop.f32.mrf.mxu3 }
  0xab   :  { %v561_v57 = vadd.f32 %v560_v55, %v471_v54  ;;  %v433_v58 = vpop.f32.mrf.mxu0  ;;  %v799_v60 = vmul.f32 0.5, %v767_v56  ;;  %v755_v55 = vld [vmem:[%s1421_s3 + $0xa0] sm:$0xff] }
  0xac   :  { %v522_v59 = vpop.f32.mrf.mxu1 }
  0xad   :  { %v523_v61 = vadd.f32 %v522_v59, %v433_v58  ;;  %831 = vst [vmem:[#allocation5] sm:$0xff] %v799_v60  ;;  %v719_v63 = vadd.f32 %v1282_v51, %v561_v57  ;;  %v740_v57 = vld [vmem:[%s1421_s3 + $0x28] sm:$0xff] }
  0xaf   :  { %v783_v1 = vadd.f32 %v751_v62, %v719_v63  ;;  %v704_v2 = vadd.f32 %v1282_v51, %v523_v61 }
  0xb1   :  { %v473_v3 = vpop.f32.mrf.mxu2  ;;  %v815_v5 = vmul.f32 0.5, %v783_v1  ;;  %v768_v6 = vadd.f32 %v736_v0, %v704_v2 }
  0xb2   :  { %v562_v4 = vpop.f32.mrf.mxu3 }
  0xb3   :  { %v563_v7 = vadd.f32 %v562_v4, %v473_v3  ;;  %v436_v8 = vpop.f32.mrf.mxu0  ;;  %847 = vst [vmem:[#allocation5 + $0x80] sm:$0xff] %v815_v5  ;;  %v800_v10 = vmul.f32 0.5, %v768_v6  ;;  %v756_v5 = vld [vmem:[%s1421_s3 + $0xa8] sm:$0xff] }
  0xb4   :  { %v525_v9 = vpop.f32.mrf.mxu1 }
  0xb5   :  { %v526_v11 = vadd.f32 %v525_v9, %v436_v8  ;;  %832 = vst [vmem:[#allocation5 + $0x8] sm:$0xff] %v800_v10  ;;  %v720_v13 = vadd.f32 %v1282_v51, %v563_v7  ;;  %v741_v7 = vld [vmem:[%s1421_s3 + $0x30] sm:$0xff] }
  0xb7   :  { %v784_v15 = vadd.f32 %v752_v12, %v720_v13  ;;  %v705_v16 = vadd.f32 %v1282_v51, %v526_v11 }
  0xb9   :  { %v476_v17 = vpop.f32.mrf.mxu2  ;;  %v816_v19 = vmul.f32 0.5, %v784_v15  ;;  %v769_v20 = vadd.f32 %v737_v14, %v705_v16 }
  0xba   :  { %v565_v18 = vpop.f32.mrf.mxu3 }
  0xbb   :  { %v566_v21 = vadd.f32 %v565_v18, %v476_v17  ;;  %v438_v22 = vpop.f32.mrf.mxu0  ;;  %848 = vst [vmem:[#allocation5 + $0x88] sm:$0xff] %v816_v19  ;;  %v801_v24 = vmul.f32 0.5, %v769_v20  ;;  %v757_v19 = vld [vmem:[%s1421_s3 + $0xb0] sm:$0xff] }
  0xbc   :  { %v527_v23 = vpop.f32.mrf.mxu1 }
  0xbd   :  { %v528_v25 = vadd.f32 %v527_v23, %v438_v22  ;;  %833 = vst [vmem:[#allocation5 + $0x10] sm:$0xff] %v801_v24  ;;  %v721_v27 = vadd.f32 %v1282_v51, %v566_v21  ;;  %v742_v21 = vld [vmem:[%s1421_s3 + $0x38] sm:$0xff] }
  0xbf   :  { %v785_v29 = vadd.f32 %v753_v26, %v721_v27  ;;  %v706_v30 = vadd.f32 %v1282_v51, %v528_v25 }
  0xc1   :  { %v478_v31 = vpop.f32.mrf.mxu2  ;;  %v817_v33 = vmul.f32 0.5, %v785_v29  ;;  %v770_v34 = vadd.f32 %v738_v28, %v706_v30 }
  0xc2   :  { %v567_v32 = vpop.f32.mrf.mxu3 }
  0xc3   :  { %v568_v35 = vadd.f32 %v567_v32, %v478_v31  ;;  %v441_v36 = vpop.f32.mrf.mxu0  ;;  %849 = vst [vmem:[#allocation5 + $0x90] sm:$0xff] %v817_v33  ;;  %v802_v38 = vmul.f32 0.5, %v770_v34  ;;  %v758_v33 = vld [vmem:[%s1421_s3 + $0xb8] sm:$0xff] }
  0xc4   :  { %v530_v37 = vpop.f32.mrf.mxu1 }
  0xc5   :  { %v531_v39 = vadd.f32 %v530_v37, %v441_v36  ;;  %834 = vst [vmem:[#allocation5 + $0x18] sm:$0xff] %v802_v38  ;;  %v722_v41 = vadd.f32 %v1282_v51, %v568_v35  ;;  %v743_v35 = vld [vmem:[%s1421_s3 + $0x40] sm:$0xff] }
  0xc7   :  { %v786_v43 = vadd.f32 %v754_v40, %v722_v41  ;;  %v707_v44 = vadd.f32 %v1282_v51, %v531_v39 }
  0xc9   :  { %v481_v45 = vpop.f32.mrf.mxu2  ;;  %v818_v47 = vmul.f32 0.5, %v786_v43  ;;  %v771_v48 = vadd.f32 %v739_v42, %v707_v44 }
  0xca   :  { %v570_v46 = vpop.f32.mrf.mxu3 }
  0xcb   :  { %v571_v49 = vadd.f32 %v570_v46, %v481_v45  ;;  %v443_v50 = vpop.f32.mrf.mxu0  ;;  %850 = vst [vmem:[#allocation5 + $0x98] sm:$0xff] %v818_v47  ;;  %v803_v53 = vmul.f32 0.5, %v771_v48  ;;  %v759_v47 = vld [vmem:[%s1421_s3 + $0xc0] sm:$0xff] }
  0xcc   :  { %v532_v52 = vpop.f32.mrf.mxu1 }
  0xcd   :  { %v533_v54 = vadd.f32 %v532_v52, %v443_v50  ;;  %835 = vst [vmem:[#allocation5 + $0x20] sm:$0xff] %v803_v53  ;;  %v723_v56 = vadd.f32 %v1282_v51, %v571_v49  ;;  %v744_v49 = vld [vmem:[%s1421_s3 + $0x48] sm:$0xff] }
  0xcf   :  { %v787_v58 = vadd.f32 %v755_v55, %v723_v56  ;;  %v708_v59 = vadd.f32 %v1282_v51, %v533_v54 }
  0xd1   :  { %v483_v60 = vpop.f32.mrf.mxu2  ;;  %v819_v62 = vmul.f32 0.5, %v787_v58  ;;  %v772_v63 = vadd.f32 %v740_v57, %v708_v59 }
  0xd2   :  { %v572_v61 = vpop.f32.mrf.mxu3 }
  0xd3   :  { %v573_v0 = vadd.f32 %v572_v61, %v483_v60  ;;  %v446_v1 = vpop.f32.mrf.mxu0  ;;  %851 = vst [vmem:[#allocation5 + $0xa0] sm:$0xff] %v819_v62  ;;  %v804_v3 = vmul.f32 0.5, %v772_v63  ;;  %v760_v62 = vld [vmem:[%s1421_s3 + $0xc8] sm:$0xff] }
  0xd4   :  { %v535_v2 = vpop.f32.mrf.mxu1 }
  0xd5   :  { %v536_v4 = vadd.f32 %v535_v2, %v446_v1  ;;  %836 = vst [vmem:[#allocation5 + $0x28] sm:$0xff] %v804_v3  ;;  %v724_v6 = vadd.f32 %v1282_v51, %v573_v0  ;;  %v745_v0 = vld [vmem:[%s1421_s3 + $0x50] sm:$0xff] }
  0xd7   :  { %v788_v8 = vadd.f32 %v756_v5, %v724_v6  ;;  %v709_v9 = vadd.f32 %v1282_v51, %v536_v4 }
  0xd9   :  { %v486_v10 = vpop.f32.mrf.mxu2  ;;  %v820_v12 = vmul.f32 0.5, %v788_v8  ;;  %v773_v13 = vadd.f32 %v741_v7, %v709_v9 }
  0xda   :  { %v575_v11 = vpop.f32.mrf.mxu3 }
  0xdb   :  { %v576_v14 = vadd.f32 %v575_v11, %v486_v10  ;;  %v448_v15 = vpop.f32.mrf.mxu0  ;;  %852 = vst [vmem:[#allocation5 + $0xa8] sm:$0xff] %v820_v12  ;;  %v805_v17 = vmul.f32 0.5, %v773_v13  ;;  %v761_v12 = vld [vmem:[%s1421_s3 + $0xd0] sm:$0xff] }
  0xdc   :  { %v537_v16 = vpop.f32.mrf.mxu1 }
  0xdd   :  { %v538_v18 = vadd.f32 %v537_v16, %v448_v15  ;;  %837 = vst [vmem:[#allocation5 + $0x30] sm:$0xff] %v805_v17  ;;  %v725_v20 = vadd.f32 %v1282_v51, %v576_v14  ;;  %v746_v14 = vld [vmem:[%s1421_s3 + $0x58] sm:$0xff] }
  0xdf   :  { %v789_v22 = vadd.f32 %v757_v19, %v725_v20  ;;  %v710_v23 = vadd.f32 %v1282_v51, %v538_v18 }
  0xe1   :  { %v488_v24 = vpop.f32.mrf.mxu2  ;;  %v821_v26 = vmul.f32 0.5, %v789_v22  ;;  %v774_v27 = vadd.f32 %v742_v21, %v710_v23 }
  0xe2   :  { %v577_v25 = vpop.f32.mrf.mxu3 }
  0xe3   :  { %v578_v28 = vadd.f32 %v577_v25, %v488_v24  ;;  %v451_v29 = vpop.f32.mrf.mxu0  ;;  %853 = vst [vmem:[#allocation5 + $0xb0] sm:$0xff] %v821_v26  ;;  %v806_v31 = vmul.f32 0.5, %v774_v27  ;;  %v762_v26 = vld [vmem:[%s1421_s3 + $0xd8] sm:$0xff] }
  0xe4   :  { %v540_v30 = vpop.f32.mrf.mxu1 }
  0xe5   :  { %v541_v32 = vadd.f32 %v540_v30, %v451_v29  ;;  %838 = vst [vmem:[#allocation5 + $0x38] sm:$0xff] %v806_v31  ;;  %v726_v34 = vadd.f32 %v1282_v51, %v578_v28  ;;  %v747_v28 = vld [vmem:[%s1421_s3 + $0x60] sm:$0xff] }
  0xe7   :  { %v790_v36 = vadd.f32 %v758_v33, %v726_v34  ;;  %v711_v37 = vadd.f32 %v1282_v51, %v541_v32 }
  0xe9   :  { %v491_v38 = vpop.f32.mrf.mxu2  ;;  %v822_v40 = vmul.f32 0.5, %v790_v36  ;;  %v775_v41 = vadd.f32 %v743_v35, %v711_v37 }
  0xea   :  { %v580_v39 = vpop.f32.mrf.mxu3 }
  0xeb   :  { %v581_v42 = vadd.f32 %v580_v39, %v491_v38  ;;  %v453_v43 = vpop.f32.mrf.mxu0  ;;  %854 = vst [vmem:[#allocation5 + $0xb8] sm:$0xff] %v822_v40  ;;  %v807_v45 = vmul.f32 0.5, %v775_v41  ;;  %v763_v40 = vld [vmem:[%s1421_s3 + $0xe0] sm:$0xff] }
  0xec   :  { %v542_v44 = vpop.f32.mrf.mxu1 }
  0xed   :  { %v543_v46 = vadd.f32 %v542_v44, %v453_v43  ;;  %839 = vst [vmem:[#allocation5 + $0x40] sm:$0xff] %v807_v45  ;;  %v727_v48 = vadd.f32 %v1282_v51, %v581_v42  ;;  %v748_v42 = vld [vmem:[%s1421_s3 + $0x68] sm:$0xff] }
  0xef   :  { %v791_v50 = vadd.f32 %v759_v47, %v727_v48  ;;  %v712_v52 = vadd.f32 %v1282_v51, %v543_v46 }
  0xf1   :  { %v493_v53 = vpop.f32.mrf.mxu2  ;;  %v823_v55 = vmul.f32 0.5, %v791_v50  ;;  %v776_v56 = vadd.f32 %v744_v49, %v712_v52 }
  0xf2   :  { %v582_v54 = vpop.f32.mrf.mxu3 }
  0xf3   :  { %v583_v57 = vadd.f32 %v582_v54, %v493_v53  ;;  %v456_v58 = vpop.f32.mrf.mxu0  ;;  %855 = vst [vmem:[#allocation5 + $0xc0] sm:$0xff] %v823_v55  ;;  %v808_v60 = vmul.f32 0.5, %v776_v56  ;;  %v764_v55 = vld [vmem:[%s1421_s3 + $0xe8] sm:$0xff] }
  0xf4   :  { %v545_v59 = vpop.f32.mrf.mxu1 }
  0xf5   :  { %v546_v61 = vadd.f32 %v545_v59, %v456_v58  ;;  %840 = vst [vmem:[#allocation5 + $0x48] sm:$0xff] %v808_v60  ;;  %v728_v63 = vadd.f32 %v1282_v51, %v583_v57  ;;  %v749_v57 = vld [vmem:[%s1421_s3 + $0x70] sm:$0xff] }
  0xf7   :  { %v792_v1 = vadd.f32 %v760_v62, %v728_v63  ;;  %v713_v2 = vadd.f32 %v1282_v51, %v546_v61 }
  0xf9   :  { %v496_v3 = vpop.f32.mrf.mxu2  ;;  %v824_v5 = vmul.f32 0.5, %v792_v1  ;;  %v777_v6 = vadd.f32 %v745_v0, %v713_v2 }
  0xfa   :  { %v585_v4 = vpop.f32.mrf.mxu3 }
  0xfb   :  { %v586_v7 = vadd.f32 %v585_v4, %v496_v3  ;;  %v458_v8 = vpop.f32.mrf.mxu0  ;;  %856 = vst [vmem:[#allocation5 + $0xc8] sm:$0xff] %v824_v5  ;;  %v809_v10 = vmul.f32 0.5, %v777_v6  ;;  %v765_v5 = vld [vmem:[%s1421_s3 + $0xf0] sm:$0xff] }
  0xfc   :  { %v547_v9 = vpop.f32.mrf.mxu1 }
  0xfd   :  { %v548_v11 = vadd.f32 %v547_v9, %v458_v8  ;;  %841 = vst [vmem:[#allocation5 + $0x50] sm:$0xff] %v809_v10  ;;  %v729_v13 = vadd.f32 %v1282_v51, %v586_v7  ;;  %v750_v7 = vld [vmem:[%s1421_s3 + $0x78] sm:$0xff] }
  0xff   :  { %v793_v15 = vadd.f32 %v761_v12, %v729_v13  ;;  %v714_v16 = vadd.f32 %v1282_v51, %v548_v11 }
 0x101   :  { %v498_v17 = vpop.f32.mrf.mxu2  ;;  %v825_v19 = vmul.f32 0.5, %v793_v15  ;;  %v778_v20 = vadd.f32 %v746_v14, %v714_v16  ;;  %v766_v16 = vld [vmem:[%s1421_s3 + $0xf8] sm:$0xff] }
 0x102   :  { %v587_v18 = vpop.f32.mrf.mxu3 }
 0x103   :  { %v588_v21 = vadd.f32 %v587_v18, %v498_v17  ;;  %v461_v22 = vpop.f32.mrf.mxu0  ;;  %857 = vst [vmem:[#allocation5 + $0xd0] sm:$0xff] %v825_v19  ;;  %v810_v24 = vmul.f32 0.5, %v778_v20 }
 0x104   :  { %v550_v23 = vpop.f32.mrf.mxu1 }
 0x105   :  { %v551_v25 = vadd.f32 %v550_v23, %v461_v22  ;;  %842 = vst [vmem:[#allocation5 + $0x58] sm:$0xff] %v810_v24  ;;  %v730_v27 = vadd.f32 %v1282_v51, %v588_v21 }
 0x107   :  { %v794_v29 = vadd.f32 %v762_v26, %v730_v27  ;;  %v715_v30 = vadd.f32 %v1282_v51, %v551_v25 }
 0x109   :  { %v501_v31 = vpop.f32.mrf.mxu2  ;;  %v826_v33 = vmul.f32 0.5, %v794_v29  ;;  %v779_v34 = vadd.f32 %v747_v28, %v715_v30 }
 0x10a   :  { %v590_v32 = vpop.f32.mrf.mxu3 }
 0x10b   :  { %v591_v35 = vadd.f32 %v590_v32, %v501_v31  ;;  %v463_v36 = vpop.f32.mrf.mxu0  ;;  %858 = vst [vmem:[#allocation5 + $0xd8] sm:$0xff] %v826_v33  ;;  %v811_v38 = vmul.f32 0.5, %v779_v34 }
 0x10c   :  { %v552_v37 = vpop.f32.mrf.mxu1 }
 0x10d   :  { %v553_v39 = vadd.f32 %v552_v37, %v463_v36  ;;  %843 = vst [vmem:[#allocation5 + $0x60] sm:$0xff] %v811_v38  ;;  %v731_v41 = vadd.f32 %v1282_v51, %v591_v35 }
 0x10f   :  { %v795_v43 = vadd.f32 %v763_v40, %v731_v41  ;;  %v716_v44 = vadd.f32 %v1282_v51, %v553_v39 }
 0x111   :  { %v503_v45 = vpop.f32.mrf.mxu2  ;;  %v827_v47 = vmul.f32 0.5, %v795_v43  ;;  %v780_v48 = vadd.f32 %v748_v42, %v716_v44 }
 0x112   :  { %v592_v46 = vpop.f32.mrf.mxu3 }
 0x113   :  { %v593_v49 = vadd.f32 %v592_v46, %v503_v45  ;;  %v466_v50 = vpop.f32.mrf.mxu0  ;;  %859 = vst [vmem:[#allocation5 + $0xe0] sm:$0xff] %v827_v47  ;;  %v812_v53 = vmul.f32 0.5, %v780_v48 }
 0x114   :  { %v555_v52 = vpop.f32.mrf.mxu1 }
 0x115   :  { %v556_v54 = vadd.f32 %v555_v52, %v466_v50  ;;  %844 = vst [vmem:[#allocation5 + $0x68] sm:$0xff] %v812_v53  ;;  %v732_v56 = vadd.f32 %v1282_v51, %v593_v49 }
 0x117   :  { %v796_v58 = vadd.f32 %v764_v55, %v732_v56  ;;  %v717_v59 = vadd.f32 %v1282_v51, %v556_v54 }
 0x119   :  { %v506_v60 = vpop.f32.mrf.mxu2  ;;  %v828_v62 = vmul.f32 0.5, %v796_v58  ;;  %v781_v63 = vadd.f32 %v749_v57, %v717_v59 }
 0x11a   :  { %v595_v61 = vpop.f32.mrf.mxu3 }
 0x11b   :  { %v596_v0 = vadd.f32 %v595_v61, %v506_v60  ;;  %v468_v1 = vpop.f32.mrf.mxu0  ;;  %860 = vst [vmem:[#allocation5 + $0xe8] sm:$0xff] %v828_v62  ;;  %v813_v3 = vmul.f32 0.5, %v781_v63 }
 0x11c   :  { %v557_v2 = vpop.f32.mrf.mxu1 }
 0x11d   :  { %v558_v4 = vadd.f32 %v557_v2, %v468_v1  ;;  %845 = vst [vmem:[#allocation5 + $0x70] sm:$0xff] %v813_v3  ;;  %v733_v6 = vadd.f32 %v1282_v51, %v596_v0 }
 0x11f   :  { %v797_v8 = vadd.f32 %v765_v5, %v733_v6  ;;  %v718_v9 = vadd.f32 %v1282_v51, %v558_v4 }
 0x121   :  { %v508_v10 = vpop.f32.mrf.mxu2  ;;  %v829_v12 = vmul.f32 0.5, %v797_v8  ;;  %v782_v13 = vadd.f32 %v750_v7, %v718_v9 }
 0x122   :  { %v597_v11 = vpop.f32.mrf.mxu3 }
 0x123   :  { %v598_v14 = vadd.f32 %v597_v11, %v508_v10  ;;  %861 = vst [vmem:[#allocation5 + $0xf0] sm:$0xff] %v829_v12  ;;  %v814_v15 = vmul.f32 0.5, %v782_v13 }
 0x125   :  { %846 = vst [vmem:[#allocation5 + $0x78] sm:$0xff] %v814_v15  ;;  %v734_v17 = vadd.f32 %v1282_v51, %v598_v14 }
 0x127   :  { %v798_v18 = vadd.f32 %v766_v16, %v734_v17 }
 0x129   :  { %v830_v19 = vmul.f32 0.5, %v798_v18 }
 0x12b   :  { %862 = vst [vmem:[#allocation5 + $0xf8] sm:$0xff] %v830_v19 }
 0x12c   :  { %875 = dma.vmem_to_hbm [thread:$0]  %s868_s13, 4096, %s870_s16, [#allocation4], %s1197_s20, %s1197_s20, %s1198_s21  }
 0x12d   :  { %1194 = dma.done.wait [#allocation4], 4096  }
 0x12e   :  { %1195 = vsyncadd [#allocation4], 4294963200 }
 0x12f   :  { %880 = vsyncpa [#allocation3], 1 }
 0x130   :  { %881 = vsyncpa [#allocation4], 1 }

// kernel: _lgc_forward_padded.2
= control target key start
LH: loop header
LB: loop body
LE: loop exit
PB: predicated region body
PF: predicated region fallthrough
CT: control target
= control target key end

     0   :  { %11 = vsyncpa [#allocation3], 0  ;;  %s1748_s0 = inlined_call_operand.hbm [shape: bf16[256,256], index: 0, kind: input, shape index: {}]   ;;  %s1749_s1 = inlined_call_operand.hbm [shape: bf16[256,128], index: 1, kind: input, shape index: {}]   ;;  %s1750_s2 = inlined_call_operand.hbm [shape: f32[1,128], index: 2, kind: input, shape index: {}]   ;;  %s1751_s3 = inlined_call_operand.hbm [shape: f32[128,128], index: 3, kind: input, shape index: {}]   ;;  %s1752_s4 = inlined_call_operand.vmem [shape: f32[256,128], index: 4, kind: output, shape index: {0}]   ;;  %s1753_s5 = inlined_call_operand.vmem [shape: bf16[256,128], index: 5, kind: output, shape index: {1}]  }
   0x1   :  { %12 = vsyncpa [#allocation5], 0  ;;  %s31_s20 = sshll.u32 %s1749_s1, 4  ;;  %s32_s20 = int_to_ptr.hbm [resolvable:$true] %s31_s20 }
   0x2   :  { %13 = vsyncpa [#allocation8], 0  ;;  %s1496_s21 = smov [#allocation4]   ;;  %s18_s25 = sshll.u32 %s1748_s0, 4  ;;  %s19_s25 = int_to_ptr.hbm [resolvable:$true] %s18_s25 }
   0x3   :  { %s33_s22 = sshll.u32 %s1496_s21, 4  ;;  %s1497_s26 = smov 64   ;;  %s34_s22 = int_to_ptr.vmem [resolvable:$true] %s33_s22 }
   0x4   :  { %s1498_s27 = smov 4   ;;  %s1499_s28 = smov [#allocation2]  }
   0x5   :  { %39 = dma.hbm_to_vmem [thread:$0]  %s32_s20, 2048, %s34_s22, [#allocation5], %s1497_s26, %s1497_s26, %s1498_s27  }
   0x6   :  { %s20_s29 = sshll.u32 %s1499_s28, 4  ;;  %s1500_s30 = smov 128   ;;  %s21_s29 = int_to_ptr.vmem [resolvable:$true] %s20_s29 }
   0x7   :  { %s1501_s6 = smov 8   ;;  %s45_s8 = sshll.u32 %s1750_s2, 4  ;;  %s46_s8 = int_to_ptr.hbm [resolvable:$true] %s45_s8 }
   0x8   :  { %26 = dma.hbm_to_vmem [thread:$0]  %s19_s25, 4096, %s21_s29, [#allocation3], %s1500_s30, %s1500_s30, %s1501_s6  }
   0x9   :  { %s1502_s9 = smov [#allocation6]   ;;  %s55_s12 = sshll.u32 %s1751_s3, 4  ;;  %s56_s12 = int_to_ptr.hbm [resolvable:$true] %s55_s12 }
   0xa   :  { %s47_s10 = sshll.u32 %s1502_s9, 4  ;;  %s1503_s13 = smov [#allocation7]   ;;  %s48_s10 = int_to_ptr.vmem [resolvable:$true] %s47_s10 }
   0xb   :  { %50 = dma.hbm_to_vmem [thread:$0]  %s46_s8, 16, %s48_s10, [#allocation5]  }
   0xc   :  { %s57_s14 = sshll.u32 %s1503_s13, 4  ;;  %s58_s14 = int_to_ptr.vmem [resolvable:$true] %s57_s14 }
   0xd   :  { %63 = dma.hbm_to_vmem [thread:$0]  %s56_s12, 2048, %s58_s14, [#allocation8], %s1500_s30, %s1500_s30, %s1501_s6  }
   0xe   :  { %1490 = dma.done.wait [#allocation3], 4096  }
   0xf   :  { %1491 = vsyncadd [#allocation3], 4294963200 }
  0x10   :  { %1492 = dma.done.wait [#allocation5], 2064  }
  0x11   :  { %1493 = vsyncadd [#allocation5], 4294965232 }
  0x12   :  { %1494 = dma.done.wait [#allocation8], 2048  }
  0x13   :  { %1495 = vsyncadd [#allocation8], 4294965248  ;;  %v1248_v0 = vld [vmem:[#allocation4 + $0x38] sm:$0xff]  ;;  %v1247_v2 = vld [vmem:[#allocation4 + $0x30] sm:$0xff] }
  0x14   :  { %v1256_v1 = vld [vmem:[#allocation4 + $0x78] sm:$0xff]  ;;  %468 = vmatpush.bf16.msra.mxu0 %v1248_v0  ;;  %1352 = vmatpush.bf16.msra.mxu3 %v1248_v0  ;;  %v1255_v3 = vld [vmem:[#allocation4 + $0x70] sm:$0xff]  ;;  %v1246_v4 = vld [vmem:[#allocation4 + $0x28] sm:$0xff] }
  0x15   :  { %557 = vmatpush.bf16.msra.mxu1 %v1256_v1  ;;  %v1254_v5 = vld [vmem:[#allocation4 + $0x68] sm:$0xff]  ;;  %v1245_v6 = vld [vmem:[#allocation4 + $0x20] sm:$0xff]  ;;  %v1244_v8 = vld [vmem:[#allocation4 + $0x18] sm:$0xff] }
  0x16   :  { %v1253_v7 = vld [vmem:[#allocation4 + $0x60] sm:$0xff]  ;;  %v1252_v9 = vld [vmem:[#allocation4 + $0x58] sm:$0xff]  ;;  %v1243_v10 = vld [vmem:[#allocation4 + $0x10] sm:$0xff] }
  0x17   :  { %v1251_v11 = vld [vmem:[#allocation4 + $0x50] sm:$0xff]  ;;  %v1242_v12 = vld [vmem:[#allocation4 + $0x8] sm:$0xff]  ;;  %v1241_v14 = vld [vmem:[#allocation4] sm:$0xff] }
  0x18   :  { %469 = vmatpush.bf16.msra.mxu0 %v1247_v2  ;;  %1353 = vmatpush.bf16.msra.mxu3 %v1247_v2  ;;  %v1250_v13 = vld [vmem:[#allocation4 + $0x48] sm:$0xff]  ;;  %v1019_v15 = vld [vmem:[#allocation2] sm:$0xf]  ;;  %v1209_v20 = vld [vmem:[#allocation2 + $0x4] sm:$0xf] }
  0x19   :  { %558 = vmatpush.bf16.msra.mxu1 %v1255_v3  ;;  %v1210_v16 = vld [vmem:[#allocation2 + $0x4] sm:$0xf0]  ;;  %v1115_v17 = vld [vmem:[#allocation2 + $0xc0] sm:$0xf]  ;;  %v1021_v21 = vld [vmem:[#allocation2 + $0x8] sm:$0xf0] }
  0x1a   :  { %v1234_v18 = vld [vmem:[#allocation2 + $0xc4] sm:$0xf0]  ;;  %v1249_v19 = vld [vmem:[#allocation4 + $0x40] sm:$0xff]  ;;  %v1020_v22 = vor.u32 %v1210_v16, %v1019_v15  ;;  %v1024_v24 = vor.u32 %v1209_v20, %v1021_v21  ;;  %v1027_v25 = vld [vmem:[#allocation2 + $0x10] sm:$0xf] }
  0x1b   :  { %v1116_v23 = vor.u32 %v1234_v18, %v1115_v17  ;;  %v1212_v26 = vld [vmem:[#allocation2 + $0x14] sm:$0xf0]  ;;  %v1123_v27 = vld [vmem:[#allocation2 + $0xd0] sm:$0xf]  ;;  %v1211_v29 = vld [vmem:[#allocation2 + $0x14] sm:$0xf] }
  0x1c   :  { %470 = vmatpush.bf16.msra.mxu0 %v1246_v4  ;;  %1354 = vmatpush.bf16.msra.mxu3 %v1246_v4  ;;  %v1236_v28 = vld [vmem:[#allocation2 + $0xd4] sm:$0xf0]  ;;  %v1029_v30 = vld [vmem:[#allocation2 + $0x18] sm:$0xf0]  ;;  %v1028_v31 = vor.u32 %v1212_v26, %v1027_v25  ;;  %v1035_v34 = vld [vmem:[#allocation2 + $0x20] sm:$0xf] }
  0x1d   :  { %559 = vmatpush.bf16.msra.mxu1 %v1254_v5  ;;  %v1124_v32 = vor.u32 %v1236_v28, %v1123_v27  ;;  %v1032_v33 = vor.u32 %v1211_v29, %v1029_v30  ;;  %v1214_v35 = vld [vmem:[#allocation2 + $0x24] sm:$0xf0]  ;;  %v1131_v36 = vld [vmem:[#allocation2 + $0xe0] sm:$0xf]  ;;  %v1213_v38 = vld [vmem:[#allocation2 + $0x24] sm:$0xf] }
  0x1e   :  { %v1238_v37 = vld [vmem:[#allocation2 + $0xe4] sm:$0xf0]  ;;  %v1037_v39 = vld [vmem:[#allocation2 + $0x28] sm:$0xf0]  ;;  %v1036_v40 = vor.u32 %v1214_v35, %v1035_v34  ;;  %v1043_v43 = vld [vmem:[#allocation2 + $0x30] sm:$0xf] }
  0x1f   :  { %v1132_v41 = vor.u32 %v1238_v37, %v1131_v36  ;;  %v1040_v42 = vor.u32 %v1213_v38, %v1037_v39  ;;  %v1216_v44 = vld [vmem:[#allocation2 + $0x34] sm:$0xf0]  ;;  %v1139_v45 = vld [vmem:[#allocation2 + $0xf0] sm:$0xf]  ;;  %v1215_v47 = vld [vmem:[#allocation2 + $0x34] sm:$0xf] }
  0x20   :  { %471 = vmatpush.bf16.msra.mxu0 %v1245_v6  ;;  %1355 = vmatpush.bf16.msra.mxu3 %v1245_v6  ;;  %v1240_v46 = vld [vmem:[#allocation2 + $0xf4] sm:$0xf0]  ;;  %v1045_v48 = vld [vmem:[#allocation2 + $0x38] sm:$0xf0]  ;;  %v1044_v49 = vor.u32 %v1216_v44, %v1043_v43  ;;  %v1051_v52 = vld [vmem:[#allocation2 + $0x40] sm:$0xf] }
  0x21   :  { %560 = vmatpush.bf16.msra.mxu1 %v1253_v7  ;;  %v1140_v50 = vor.u32 %v1240_v46, %v1139_v45  ;;  %v1048_v51 = vor.u32 %v1215_v47, %v1045_v48  ;;  %v1218_v53 = vld [vmem:[#allocation2 + $0x44] sm:$0xf0]  ;;  %v1233_v54 = vld [vmem:[#allocation2 + $0xc4] sm:$0xf]  ;;  %v1117_v55 = vld [vmem:[#allocation2 + $0xc8] sm:$0xf0] }
  0x22   :  { %v1217_v56 = vld [vmem:[#allocation2 + $0x44] sm:$0xf]  ;;  %v1053_v57 = vld [vmem:[#allocation2 + $0x48] sm:$0xf0]  ;;  %v1052_v58 = vor.u32 %v1218_v53, %v1051_v52  ;;  %v1120_v59 = vor.u32 %v1233_v54, %v1117_v55  ;;  %v828_v61 = vld [vmem:[#allocation7 + $0x78] sm:$0xff] }
  0x23   :  { %v1056_v60 = vor.u32 %v1217_v56, %v1053_v57  ;;  %v827_v62 = vld [vmem:[#allocation7 + $0x70] sm:$0xff]  ;;  %829 = vmatpush.msra.mxu2 %v828_v61  ;;  %v1125_v2 = vld [vmem:[#allocation2 + $0xd8] sm:$0xf0]  ;;  %v825_v6 = vld [vmem:[#allocation7 + $0x60] sm:$0xff] }
  0x24   :  { %472 = vmatpush.bf16.msra.mxu0 %v1244_v8  ;;  %1356 = vmatpush.bf16.msra.mxu3 %v1244_v8  ;;  %v1059_v63 = vld [vmem:[#allocation2 + $0x50] sm:$0xf]  ;;  %v1220_v0 = vld [vmem:[#allocation2 + $0x54] sm:$0xf0]  ;;  %v1219_v4 = vld [vmem:[#allocation2 + $0x54] sm:$0xf] }
  0x25   :  { %561 = vmatpush.bf16.msra.mxu1 %v1252_v9  ;;  %830 = vmatpush.msra.mxu2 %v827_v62  ;;  %v819_v15 = vld [vmem:[#allocation7 + $0x30] sm:$0xff]  ;;  %v1067_v16 = vld [vmem:[#allocation2 + $0x60] sm:$0xf]  ;;  %v1222_v17 = vld [vmem:[#allocation2 + $0x64] sm:$0xf0] }
  0x26   :  { %v1237_v18 = vld [vmem:[#allocation2 + $0xe4] sm:$0xf]  ;;  %v818_v20 = vld [vmem:[#allocation7 + $0x28] sm:$0xff]  ;;  %v816_v27 = vld [vmem:[#allocation7 + $0x18] sm:$0xff] }
  0x27   :  { %v1221_v21 = vld [vmem:[#allocation2 + $0x64] sm:$0xf]  ;;  %v815_v28 = vld [vmem:[#allocation7 + $0x10] sm:$0xff]  ;;  %v814_v29 = vld [vmem:[#allocation7 + $0x8] sm:$0xff] }
  0x28   :  { %473 = vmatpush.bf16.msra.mxu0 %v1243_v10  ;;  %1357 = vmatpush.bf16.msra.mxu3 %v1243_v10  ;;  %v824_v10 = vld [vmem:[#allocation7 + $0x58] sm:$0xff]  ;;  %v813_v30 = vld [vmem:[#allocation7] sm:$0xff]  ;;  %v1223_v35 = vld [vmem:[#allocation2 + $0x74] sm:$0xf] }
  0x29   :  { %562 = vmatpush.bf16.msra.mxu1 %v1251_v11  ;;  %v1141_v34 = vld [vmem:[#allocation2 + $0xf8] sm:$0xf0]  ;;  %v1085_v43 = vld [vmem:[#allocation2 + $0x88] sm:$0xf0]  ;;  %v1091_v55 = vld [vmem:[#allocation2 + $0x90] sm:$0xf] }
  0x2a   :  { %v1077_v36 = vld [vmem:[#allocation2 + $0x78] sm:$0xf0]  ;;  %v1228_v56 = vld [vmem:[#allocation2 + $0x94] sm:$0xf0]  ;;  %v1227_v57 = vld [vmem:[#allocation2 + $0x94] sm:$0xf] }
  0x2b   :  { %v1080_v39 = vor.u32 %v1223_v35, %v1077_v36 }
  0x2c   :  { %474 = vmatpush.bf16.msra.mxu0 %v1242_v12  ;;  %1358 = vmatpush.bf16.msra.mxu3 %v1242_v12  ;;  %v822_v12 = vld [vmem:[#allocation7 + $0x48] sm:$0xff] }
  0x2d   :  { %563 = vmatpush.bf16.msra.mxu1 %v1250_v13 }
  0x30   :  { %475 = vmatpush.bf16.msra.mxu0 %v1241_v14  ;;  %1359 = vmatpush.bf16.msra.mxu3 %v1241_v14  ;;  %v820_v14 = vld [vmem:[#allocation7 + $0x38] sm:$0xff] }
  0x31   :  { %564 = vmatpush.bf16.msra.mxu1 %v1249_v19 }
  0x33   :  { %476 = vmatmul.bf16.vlgmr.msra.gmra.mxu0 %v1020_v22  ;;  %536 = vmatmul.bf16.vlgmr.msra.gmra.mxu3 %v1116_v23  ;;  %v1069_v22 = vld [vmem:[#allocation2 + $0x68] sm:$0xf0]  ;;  %v817_v23 = vld [vmem:[#allocation7 + $0x20] sm:$0xff] }
  0x34   :  { %1360 = vmatpush.bf16.msrb.mxu3 %v1256_v1  ;;  %565 = vmatmul.bf16.vlgmr.msra.gmra.mxu1 %v1024_v24  ;;  %v1235_v1 = vld [vmem:[#allocation2 + $0xd4] sm:$0xf]  ;;  %v1068_v24 = vor.u32 %v1222_v17, %v1067_v16  ;;  %v1072_v26 = vor.u32 %v1221_v21, %v1069_v22 }
  0x35   :  { %v1128_v8 = vor.u32 %v1235_v1, %v1125_v2 }
  0x38   :  { %1361 = vmatpush.bf16.msrb.mxu3 %v1255_v3  ;;  %v826_v3 = vld [vmem:[#allocation7 + $0x68] sm:$0xff] }
  0x39   :  { %831 = vmatpush.msra.mxu2 %v826_v3 }
  0x3b   :  { %832 = vmatpush.msra.mxu2 %v825_v6 }
  0x3c   :  { %1362 = vmatpush.bf16.msrb.mxu3 %v1254_v5  ;;  %v1061_v5 = vld [vmem:[#allocation2 + $0x58] sm:$0xf0] }
  0x3d   :  { %833 = vmatpush.msra.mxu2 %v824_v10 }
  0x40   :  { %1363 = vmatpush.bf16.msrb.mxu3 %v1253_v7  ;;  %v1060_v7 = vor.u32 %v1220_v0, %v1059_v63 }
  0x43   :  { %481 = vmatmul.bf16.gmra.mxu0 %v1028_v31  ;;  %541 = vmatmul.bf16.gmra.mxu3 %v1124_v32  ;;  %v1075_v31 = vld [vmem:[#allocation2 + $0x70] sm:$0xf]  ;;  %v1224_v32 = vld [vmem:[#allocation2 + $0x74] sm:$0xf0] }
  0x44   :  { %1364 = vmatpush.bf16.msrb.mxu3 %v1252_v9  ;;  %570 = vmatmul.bf16.gmra.mxu1 %v1032_v33  ;;  %v1064_v9 = vor.u32 %v1219_v4, %v1061_v5  ;;  %v1239_v33 = vld [vmem:[#allocation2 + $0xf4] sm:$0xf]  ;;  %v1076_v37 = vor.u32 %v1224_v32, %v1075_v31 }
  0x45   :  { %v1144_v38 = vor.u32 %v1239_v33, %v1141_v34 }
  0x48   :  { %1365 = vmatpush.bf16.msrb.mxu3 %v1251_v11  ;;  %v823_v11 = vld [vmem:[#allocation7 + $0x50] sm:$0xff] }
  0x49   :  { %834 = vmatpush.msra.mxu2 %v823_v11 }
  0x4b   :  { %835 = vmatpush.msra.mxu2 %v822_v12 }
  0x4c   :  { %1366 = vmatpush.bf16.msrb.mxu3 %v1250_v13  ;;  %v821_v13 = vld [vmem:[#allocation7 + $0x40] sm:$0xff] }
  0x4d   :  { %836 = vmatpush.msra.mxu2 %v821_v13 }
  0x4f   :  { %837 = vmatpush.msra.mxu2 %v820_v14 }
  0x50   :  { %1367 = vmatpush.bf16.msrb.mxu3 %v1249_v19  ;;  %v1133_v19 = vld [vmem:[#allocation2 + $0xe8] sm:$0xf0] }
  0x51   :  { %838 = vmatpush.msra.mxu2 %v819_v15  ;;  %v1136_v25 = vor.u32 %v1237_v18, %v1133_v19 }
  0x53   :  { %486 = vmatmul.bf16.gmra.mxu0 %v1036_v40  ;;  %546 = vmatmul.bf16.gmra.mxu3 %v1132_v41  ;;  %v1083_v40 = vld [vmem:[#allocation2 + $0x80] sm:$0xf]  ;;  %v1226_v41 = vld [vmem:[#allocation2 + $0x84] sm:$0xf0] }
  0x54   :  { %575 = vmatmul.bf16.gmra.mxu1 %v1040_v42  ;;  %1368 = vmatpush.msra.mxu3 %v828_v61  ;;  %v1225_v42 = vld [vmem:[#allocation2 + $0x84] sm:$0xf]  ;;  %v1084_v44 = vor.u32 %v1226_v41, %v1083_v40  ;;  %v1092_v61 = vor.u32 %v1228_v56, %v1091_v55 }
  0x55   :  { %839 = vmatpush.msra.mxu2 %v818_v20  ;;  %v1088_v46 = vor.u32 %v1225_v42, %v1085_v43 }
  0x56   :  { %1369 = vmatpush.msra.mxu3 %v827_v62 }
  0x57   :  { %840 = vmatpush.msra.mxu2 %v817_v23 }
  0x58   :  { %1370 = vmatpush.msra.mxu3 %v826_v3 }
  0x59   :  { %841 = vmatpush.msra.mxu2 %v816_v27 }
  0x5a   :  { %1371 = vmatpush.msra.mxu3 %v825_v6 }
  0x5b   :  { %842 = vmatpush.msra.mxu2 %v815_v28 }
  0x5c   :  { %1372 = vmatpush.msra.mxu3 %v824_v10  ;;  %v1101_v10 = vld [vmem:[#allocation2 + $0xa8] sm:$0xf0] }
  0x5d   :  { %843 = vmatpush.msra.mxu2 %v814_v29 }
  0x5e   :  { %1373 = vmatpush.msra.mxu3 %v823_v11 }
  0x5f   :  { %844 = vmatpush.msra.mxu2 %v813_v30 }
  0x60   :  { %1374 = vmatpush.msra.mxu3 %v822_v12 }
  0x62   :  { %1375 = vmatpush.msra.mxu3 %v821_v13 }
  0x63   :  { %491 = vmatmul.bf16.gmra.mxu0 %v1044_v49  ;;  %551 = vmatmul.bf16.gmra.mxu3 %v1140_v50  ;;  %v1546_v49 = vld [vmem:[#allocation6] ss:$0 sm:$0xff] }
  0x64   :  { %580 = vmatmul.bf16.gmra.mxu1 %v1048_v51  ;;  %1376 = vmatpush.msra.mxu3 %v820_v14 }
  0x66   :  { %1377 = vmatpush.msra.mxu3 %v819_v15 }
  0x68   :  { %1378 = vmatpush.msra.mxu3 %v818_v20 }
  0x6a   :  { %1379 = vmatpush.msra.mxu3 %v817_v23  ;;  %v1107_v23 = vld [vmem:[#allocation2 + $0xb0] sm:$0xf] }
  0x6c   :  { %1380 = vmatpush.msra.mxu3 %v816_v27 }
  0x6e   :  { %1381 = vmatpush.msra.mxu3 %v815_v28 }
  0x70   :  { %1382 = vmatpush.msra.mxu3 %v814_v29 }
  0x72   :  { %1383 = vmatpush.msra.mxu3 %v813_v30 }
  0x73   :  { %496 = vmatmul.bf16.gmra.mxu0 %v1052_v58  ;;  %625 = vmatmul.bf16.vlgmr.msrb.gmra.mxu3 %v1120_v59  ;;  %v1093_v58 = vld [vmem:[#allocation2 + $0x98] sm:$0xf0] }
  0x74   :  { %585 = vmatmul.bf16.gmra.mxu1 %v1056_v60  ;;  %v1096_v63 = vor.u32 %v1227_v57, %v1093_v58 }
  0x83   :  { %501 = vmatmul.bf16.gmra.mxu0 %v1060_v7  ;;  %630 = vmatmul.bf16.gmra.mxu3 %v1128_v8  ;;  %v1099_v7 = vld [vmem:[#allocation2 + $0xa0] sm:$0xf]  ;;  %v1230_v8 = vld [vmem:[#allocation2 + $0xa4] sm:$0xf0] }
  0x84   :  { %590 = vmatmul.bf16.gmra.mxu1 %v1064_v9  ;;  %v1229_v9 = vld [vmem:[#allocation2 + $0xa4] sm:$0xf]  ;;  %v1100_v13 = vor.u32 %v1230_v8, %v1099_v7 }
  0x85   :  { %v1104_v15 = vor.u32 %v1229_v9, %v1101_v10 }
  0x93   :  { %506 = vmatmul.bf16.gmra.mxu0 %v1068_v24  ;;  %635 = vmatmul.bf16.gmra.mxu3 %v1136_v25  ;;  %v1232_v24 = vld [vmem:[#allocation2 + $0xb4] sm:$0xf0]  ;;  %v1231_v25 = vld [vmem:[#allocation2 + $0xb4] sm:$0xf] }
  0x94   :  { %595 = vmatmul.bf16.gmra.mxu1 %v1072_v26  ;;  %v1109_v26 = vld [vmem:[#allocation2 + $0xb8] sm:$0xf0]  ;;  %v1108_v29 = vor.u32 %v1232_v24, %v1107_v23 }
  0x95   :  { %v1112_v31 = vor.u32 %v1231_v25, %v1109_v26 }
  0xa3   :  { %511 = vmatmul.bf16.gmra.mxu0 %v1076_v37  ;;  %640 = vmatmul.bf16.gmra.mxu3 %v1144_v38 }
  0xa4   :  { %600 = vmatmul.bf16.gmra.mxu1 %v1080_v39 }
  0xb0   :  { %v477_v45 = vpop.f32.mrf.mxu0 }
  0xb1   :  { %v566_v47 = vpop.f32.mrf.mxu1 }
  0xb2   :  { %v567_v48 = vadd.f32 %v566_v47, %v477_v45 }
  0xb3   :  { %516 = vmatmul.bf16.gmra.mxu0 %v1084_v44 }
  0xb4   :  { %605 = vmatmul.bf16.gmra.mxu1 %v1088_v46  ;;  %v749_v51 = vadd.f32 %v1546_v49, %v567_v48 }
  0xb6   :  { %v1548_v50 = vpop.f32.mrf.mxu3  ;;  %781 = vst [vmem:[%s1752_s4] sm:$0xff] %v749_v51  ;;  %845 = vmatmul.f32.vlgmr.msra.gmra.mxu2 %v749_v51 }
  0xb8   :  { %v479_v52 = vpop.f32.mrf.mxu0 }
  0xb9   :  { %v568_v53 = vpop.f32.mrf.mxu1 }
  0xba   :  { %v569_v54 = vadd.f32 %v568_v53, %v479_v52 }
  0xbc   :  { %v750_v60 = vadd.f32 %v1546_v49, %v569_v54 }
  0xbe   :  { %v1554_v59 = vpop.f32.mrf.mxu3  ;;  %782 = vst [vmem:[%s1752_s4 + $0x8] sm:$0xff] %v750_v60  ;;  %848 = vmatmul.f32.gmra.mxu2 %v750_v60 }
  0xc0   :  { %v482_v62 = vpop.f32.mrf.mxu0 }
  0xc1   :  { %v571_v0 = vpop.f32.mrf.mxu1 }
  0xc2   :  { %v572_v1 = vadd.f32 %v571_v0, %v482_v62 }
  0xc3   :  { %521 = vmatmul.bf16.gmra.mxu0 %v1092_v61 }
  0xc4   :  { %610 = vmatmul.bf16.gmra.mxu1 %v1096_v63  ;;  %v751_v3 = vadd.f32 %v1546_v49, %v572_v1 }
  0xc6   :  { %v1560_v2 = vpop.f32.mrf.mxu3  ;;  %783 = vst [vmem:[%s1752_s4 + $0x10] sm:$0xff] %v751_v3  ;;  %851 = vmatmul.f32.gmra.mxu2 %v751_v3 }
  0xc8   :  { %v484_v4 = vpop.f32.mrf.mxu0 }
  0xc9   :  { %v573_v5 = vpop.f32.mrf.mxu1 }
  0xca   :  { %v574_v6 = vadd.f32 %v573_v5, %v484_v4 }
  0xcc   :  { %v752_v12 = vadd.f32 %v1546_v49, %v574_v6 }
  0xce   :  { %v1566_v11 = vpop.f32.mrf.mxu3  ;;  %784 = vst [vmem:[%s1752_s4 + $0x18] sm:$0xff] %v752_v12  ;;  %854 = vmatmul.f32.gmra.mxu2 %v752_v12 }
  0xd0   :  { %v487_v14 = vpop.f32.mrf.mxu0 }
  0xd1   :  { %v576_v16 = vpop.f32.mrf.mxu1 }
  0xd2   :  { %v577_v17 = vadd.f32 %v576_v16, %v487_v14 }
  0xd3   :  { %526 = vmatmul.bf16.gmra.mxu0 %v1100_v13 }
  0xd4   :  { %615 = vmatmul.bf16.gmra.mxu1 %v1104_v15  ;;  %v753_v19 = vadd.f32 %v1546_v49, %v577_v17 }
  0xd6   :  { %v1572_v18 = vpop.f32.mrf.mxu3  ;;  %785 = vst [vmem:[%s1752_s4 + $0x20] sm:$0xff] %v753_v19  ;;  %857 = vmatmul.f32.gmra.mxu2 %v753_v19 }
  0xd8   :  { %v489_v20 = vpop.f32.mrf.mxu0 }
  0xd9   :  { %v578_v21 = vpop.f32.mrf.mxu1 }
  0xda   :  { %v579_v22 = vadd.f32 %v578_v21, %v489_v20 }
  0xdc   :  { %v754_v28 = vadd.f32 %v1546_v49, %v579_v22 }
  0xde   :  { %v1578_v27 = vpop.f32.mrf.mxu3  ;;  %786 = vst [vmem:[%s1752_s4 + $0x28] sm:$0xff] %v754_v28  ;;  %860 = vmatmul.f32.gmra.mxu2 %v754_v28 }
  0xe0   :  { %v492_v30 = vpop.f32.mrf.mxu0 }
  0xe1   :  { %v581_v32 = vpop.f32.mrf.mxu1 }
  0xe2   :  { %v582_v33 = vadd.f32 %v581_v32, %v492_v30 }
  0xe3   :  { %531 = vmatmul.bf16.gmra.mxu0 %v1108_v29 }
  0xe4   :  { %620 = vmatmul.bf16.gmra.mxu1 %v1112_v31  ;;  %v755_v35 = vadd.f32 %v1546_v49, %v582_v33 }
  0xe6   :  { %v1584_v34 = vpop.f32.mrf.mxu3  ;;  %787 = vst [vmem:[%s1752_s4 + $0x30] sm:$0xff] %v755_v35  ;;  %863 = vmatmul.f32.gmra.mxu2 %v755_v35 }
  0xe8   :  { %v494_v36 = vpop.f32.mrf.mxu0 }
  0xe9   :  { %v583_v37 = vpop.f32.mrf.mxu1 }
  0xea   :  { %v584_v38 = vadd.f32 %v583_v37, %v494_v36 }
  0xec   :  { %v756_v40 = vadd.f32 %v1546_v49, %v584_v38 }
  0xee   :  { %v1590_v39 = vpop.f32.mrf.mxu3  ;;  %788 = vst [vmem:[%s1752_s4 + $0x38] sm:$0xff] %v756_v40  ;;  %866 = vmatmul.f32.gmra.mxu2 %v756_v40 }
  0xf0   :  { %v497_v41 = vpop.f32.mrf.mxu0 }
  0xf1   :  { %v586_v42 = vpop.f32.mrf.mxu1 }
  0xf2   :  { %v587_v43 = vadd.f32 %v586_v42, %v497_v41 }
  0xf4   :  { %v757_v45 = vadd.f32 %v1546_v49, %v587_v43 }
  0xf6   :  { %v626_v44 = vpop.f32.mrf.mxu3  ;;  %789 = vst [vmem:[%s1752_s4 + $0x40] sm:$0xff] %v757_v45  ;;  %869 = vmatmul.f32.gmra.mxu2 %v757_v45 }
  0xf7   :  { %v627_v46 = vadd.f32 %v626_v44, %v1548_v50 }
  0xf8   :  { %v499_v47 = vpop.f32.mrf.mxu0 }
  0xf9   :  { %v588_v48 = vpop.f32.mrf.mxu1  ;;  %v773_v52 = vadd.f32 %v1546_v49, %v627_v46 }
  0xfa   :  { %v589_v51 = vadd.f32 %v588_v48, %v499_v47 }
  0xfb   :  { %805 = vst [vmem:[%s1752_s4 + $0xc0] sm:$0xff] %v773_v52  ;;  %917 = vmatmul.f32.vlgmr.msra.gmra.mxu3 %v773_v52 }
  0xfc   :  { %v758_v54 = vadd.f32 %v1546_v49, %v589_v51 }
  0xfe   :  { %v628_v53 = vpop.f32.mrf.mxu3  ;;  %790 = vst [vmem:[%s1752_s4 + $0x48] sm:$0xff] %v758_v54  ;;  %872 = vmatmul.f32.gmra.mxu2 %v758_v54 }
  0xff   :  { %v629_v50 = vadd.f32 %v628_v53, %v1554_v59 }
 0x100   :  { %v502_v55 = vpop.f32.mrf.mxu0 }
 0x101   :  { %v591_v56 = vpop.f32.mrf.mxu1  ;;  %v774_v58 = vadd.f32 %v1546_v49, %v629_v50 }
 0x102   :  { %v592_v57 = vadd.f32 %v591_v56, %v502_v55 }
 0x103   :  { %806 = vst [vmem:[%s1752_s4 + $0xc8] sm:$0xff] %v774_v58  ;;  %920 = vmatmul.f32.gmra.mxu3 %v774_v58 }
 0x104   :  { %v759_v61 = vadd.f32 %v1546_v49, %v592_v57 }
 0x106   :  { %v631_v60 = vpop.f32.mrf.mxu3  ;;  %791 = vst [vmem:[%s1752_s4 + $0x50] sm:$0xff] %v759_v61  ;;  %875 = vmatmul.f32.gmra.mxu2 %v759_v61 }
 0x107   :  { %v632_v59 = vadd.f32 %v631_v60, %v1560_v2 }
 0x108   :  { %v504_v62 = vpop.f32.mrf.mxu0 }
 0x109   :  { %v593_v63 = vpop.f32.mrf.mxu1  ;;  %v775_v1 = vadd.f32 %v1546_v49, %v632_v59 }
 0x10a   :  { %v594_v0 = vadd.f32 %v593_v63, %v504_v62 }
 0x10b   :  { %807 = vst [vmem:[%s1752_s4 + $0xd0] sm:$0xff] %v775_v1  ;;  %923 = vmatmul.f32.gmra.mxu3 %v775_v1 }
 0x10c   :  { %v760_v4 = vadd.f32 %v1546_v49, %v594_v0 }
 0x10e   :  { %v633_v3 = vpop.f32.mrf.mxu3  ;;  %792 = vst [vmem:[%s1752_s4 + $0x58] sm:$0xff] %v760_v4  ;;  %878 = vmatmul.f32.gmra.mxu2 %v760_v4 }
 0x10f   :  { %v634_v2 = vadd.f32 %v633_v3, %v1566_v11 }
 0x110   :  { %v507_v5 = vpop.f32.mrf.mxu0 }
 0x111   :  { %v596_v6 = vpop.f32.mrf.mxu1  ;;  %v776_v8 = vadd.f32 %v1546_v49, %v634_v2 }
 0x112   :  { %v597_v7 = vadd.f32 %v596_v6, %v507_v5 }
 0x113   :  { %808 = vst [vmem:[%s1752_s4 + $0xd8] sm:$0xff] %v776_v8  ;;  %926 = vmatmul.f32.gmra.mxu3 %v776_v8 }
 0x114   :  { %v761_v10 = vadd.f32 %v1546_v49, %v597_v7 }
 0x116   :  { %v636_v9 = vpop.f32.mrf.mxu3  ;;  %793 = vst [vmem:[%s1752_s4 + $0x60] sm:$0xff] %v761_v10  ;;  %881 = vmatmul.f32.gmra.mxu2 %v761_v10 }
 0x117   :  { %v637_v11 = vadd.f32 %v636_v9, %v1572_v18 }
 0x118   :  { %v509_v12 = vpop.f32.mrf.mxu0 }
 0x119   :  { %v598_v13 = vpop.f32.mrf.mxu1  ;;  %v777_v15 = vadd.f32 %v1546_v49, %v637_v11 }
 0x11a   :  { %v599_v14 = vadd.f32 %v598_v13, %v509_v12 }
 0x11b   :  { %809 = vst [vmem:[%s1752_s4 + $0xe0] sm:$0xff] %v777_v15  ;;  %929 = vmatmul.f32.gmra.mxu3 %v777_v15 }
 0x11c   :  { %v762_v17 = vadd.f32 %v1546_v49, %v599_v14 }
 0x11e   :  { %v638_v16 = vpop.f32.mrf.mxu3  ;;  %794 = vst [vmem:[%s1752_s4 + $0x68] sm:$0xff] %v762_v17  ;;  %884 = vmatmul.f32.gmra.mxu2 %v762_v17 }
 0x11f   :  { %v639_v18 = vadd.f32 %v638_v16, %v1578_v27 }
 0x120   :  { %v512_v19 = vpop.f32.mrf.mxu0 }
 0x121   :  { %v601_v20 = vpop.f32.mrf.mxu1  ;;  %v778_v22 = vadd.f32 %v1546_v49, %v639_v18 }
 0x122   :  { %v602_v21 = vadd.f32 %v601_v20, %v512_v19 }
 0x123   :  { %810 = vst [vmem:[%s1752_s4 + $0xe8] sm:$0xff] %v778_v22  ;;  %932 = vmatmul.f32.gmra.mxu3 %v778_v22 }
 0x124   :  { %v763_v24 = vadd.f32 %v1546_v49, %v602_v21 }
 0x126   :  { %v641_v23 = vpop.f32.mrf.mxu3  ;;  %795 = vst [vmem:[%s1752_s4 + $0x70] sm:$0xff] %v763_v24  ;;  %887 = vmatmul.f32.gmra.mxu2 %v763_v24 }
 0x127   :  { %v642_v25 = vadd.f32 %v641_v23, %v1584_v34 }
 0x128   :  { %v514_v26 = vpop.f32.mrf.mxu0 }
 0x129   :  { %v603_v27 = vpop.f32.mrf.mxu1  ;;  %v779_v29 = vadd.f32 %v1546_v49, %v642_v25 }
 0x12a   :  { %v604_v28 = vadd.f32 %v603_v27, %v514_v26 }
 0x12b   :  { %811 = vst [vmem:[%s1752_s4 + $0xf0] sm:$0xff] %v779_v29  ;;  %935 = vmatmul.f32.gmra.mxu3 %v779_v29 }
 0x12c   :  { %v764_v31 = vadd.f32 %v1546_v49, %v604_v28 }
 0x12e   :  { %v643_v30 = vpop.f32.mrf.mxu3  ;;  %796 = vst [vmem:[%s1752_s4 + $0x78] sm:$0xff] %v764_v31  ;;  %890 = vmatmul.f32.gmra.mxu2 %v764_v31 }
 0x12f   :  { %v644_v32 = vadd.f32 %v643_v30, %v1590_v39 }
 0x130   :  { %v517_v33 = vpop.f32.mrf.mxu0 }
 0x131   :  { %v606_v34 = vpop.f32.mrf.mxu1  ;;  %v780_v36 = vadd.f32 %v1546_v49, %v644_v32 }
 0x132   :  { %v607_v35 = vadd.f32 %v606_v34, %v517_v33 }
 0x133   :  { %812 = vst [vmem:[%s1752_s4 + $0xf8] sm:$0xff] %v780_v36  ;;  %938 = vmatmul.f32.gmra.mxu3 %v780_v36 }
 0x134   :  { %v765_v37 = vadd.f32 %v1546_v49, %v607_v35 }
 0x136   :  { %797 = vst [vmem:[%s1752_s4 + $0x80] sm:$0xff] %v765_v37  ;;  %893 = vmatmul.f32.gmra.mxu2 %v765_v37 }
 0x138   :  { %v519_v38 = vpop.f32.mrf.mxu0 }
 0x139   :  { %v608_v39 = vpop.f32.mrf.mxu1  ;;  %v846_v41 = vpop.f32.mrf.mxu2 }
 0x13a   :  { %v609_v40 = vadd.f32 %v608_v39, %v519_v38 }
 0x13c   :  { %v766_v42 = vadd.f32 %v1546_v49, %v609_v40 }
 0x13e   :  { %798 = vst [vmem:[%s1752_s4 + $0x88] sm:$0xff] %v766_v42  ;;  %896 = vmatmul.f32.gmra.mxu2 %v766_v42 }
 0x140   :  { %v522_v43 = vpop.f32.mrf.mxu0 }
 0x141   :  { %v611_v44 = vpop.f32.mrf.mxu1  ;;  %v849_v46 = vpop.f32.mrf.mxu2 }
 0x142   :  { %v612_v45 = vadd.f32 %v611_v44, %v522_v43  ;;  %v1260_v47 = vpack.c.bf16 %v849_v46, %v846_v41 }
 0x144   :  { %1261 = vst [vmem:[%s1753_s5] sm:$0xff] %v1260_v47   ;;  %v767_v48 = vadd.f32 %v1546_v49, %v612_v45 }
 0x146   :  { %799 = vst [vmem:[%s1752_s4 + $0x90] sm:$0xff] %v767_v48  ;;  %899 = vmatmul.f32.gmra.mxu2 %v767_v48 }
 0x148   :  { %v524_v51 = vpop.f32.mrf.mxu0 }
 0x149   :  { %v613_v52 = vpop.f32.mrf.mxu1  ;;  %v852_v54 = vpop.f32.mrf.mxu2 }
 0x14a   :  { %v614_v53 = vadd.f32 %v613_v52, %v524_v51 }
 0x14c   :  { %v768_v50 = vadd.f32 %v1546_v49, %v614_v53 }
 0x14e   :  { %800 = vst [vmem:[%s1752_s4 + $0x98] sm:$0xff] %v768_v50  ;;  %902 = vmatmul.f32.gmra.mxu2 %v768_v50 }
 0x150   :  { %v527_v55 = vpop.f32.mrf.mxu0 }
 0x151   :  { %v616_v56 = vpop.f32.mrf.mxu1  ;;  %v855_v58 = vpop.f32.mrf.mxu2 }
 0x152   :  { %v617_v57 = vadd.f32 %v616_v56, %v527_v55  ;;  %v1265_v60 = vpack.c.bf16 %v855_v58, %v852_v54 }
 0x154   :  { %1337 = vst [vmem:[%s1753_s5 + $0x8] sm:$0xff] %v1265_v60   ;;  %v769_v61 = vadd.f32 %v1546_v49, %v617_v57 }
 0x156   :  { %801 = vst [vmem:[%s1752_s4 + $0xa0] sm:$0xff] %v769_v61  ;;  %905 = vmatmul.f32.gmra.mxu2 %v769_v61 }
 0x158   :  { %v529_v59 = vpop.f32.mrf.mxu0 }
 0x159   :  { %v618_v62 = vpop.f32.mrf.mxu1  ;;  %v858_v0 = vpop.f32.mrf.mxu2 }
 0x15a   :  { %v619_v63 = vadd.f32 %v618_v62, %v529_v59 }
 0x15c   :  { %v770_v1 = vadd.f32 %v1546_v49, %v619_v63 }
 0x15e   :  { %802 = vst [vmem:[%s1752_s4 + $0xa8] sm:$0xff] %v770_v1  ;;  %908 = vmatmul.f32.gmra.mxu2 %v770_v1 }
 0x160   :  { %v532_v3 = vpop.f32.mrf.mxu0 }
 0x161   :  { %v621_v4 = vpop.f32.mrf.mxu1  ;;  %v861_v5 = vpop.f32.mrf.mxu2 }
 0x162   :  { %v622_v2 = vadd.f32 %v621_v4, %v532_v3  ;;  %v1270_v6 = vpack.c.bf16 %v861_v5, %v858_v0 }
 0x164   :  { %1338 = vst [vmem:[%s1753_s5 + $0x10] sm:$0xff] %v1270_v6   ;;  %v771_v7 = vadd.f32 %v1546_v49, %v622_v2 }
 0x166   :  { %803 = vst [vmem:[%s1752_s4 + $0xb0] sm:$0xff] %v771_v7  ;;  %911 = vmatmul.f32.gmra.mxu2 %v771_v7 }
 0x168   :  { %v534_v8 = vpop.f32.mrf.mxu0 }
 0x169   :  { %v623_v9 = vpop.f32.mrf.mxu1  ;;  %v864_v11 = vpop.f32.mrf.mxu2 }
 0x16a   :  { %v624_v10 = vadd.f32 %v623_v9, %v534_v8 }
 0x16c   :  { %v772_v12 = vadd.f32 %v1546_v49, %v624_v10 }
 0x16e   :  { %804 = vst [vmem:[%s1752_s4 + $0xb8] sm:$0xff] %v772_v12  ;;  %914 = vmatmul.f32.gmra.mxu2 %v772_v12 }
 0x171   :  { %v867_v13 = vpop.f32.mrf.mxu2 }
 0x172   :  { %v1275_v14 = vpack.c.bf16 %v867_v13, %v864_v11 }
 0x174   :  { %1339 = vst [vmem:[%s1753_s5 + $0x18] sm:$0xff] %v1275_v14  }
 0x179   :  { %v870_v15 = vpop.f32.mrf.mxu2 }
 0x17e   :  { %v918_v16 = vpop.f32.mrf.mxu3 }
 0x181   :  { %v873_v17 = vpop.f32.mrf.mxu2 }
 0x182   :  { %v1280_v18 = vpack.c.bf16 %v873_v17, %v870_v15 }
 0x184   :  { %1340 = vst [vmem:[%s1753_s5 + $0x20] sm:$0xff] %v1280_v18  }
 0x186   :  { %v921_v49 = vpop.f32.mrf.mxu3 }
 0x187   :  { %v1320_v19 = vpack.c.bf16 %v921_v49, %v918_v16 }
 0x189   :  { %1348 = vst [vmem:[%s1753_s5 + $0x60] sm:$0xff] %v1320_v19   ;;  %v876_v20 = vpop.f32.mrf.mxu2 }
 0x18e   :  { %v924_v21 = vpop.f32.mrf.mxu3 }
 0x191   :  { %v879_v22 = vpop.f32.mrf.mxu2 }
 0x192   :  { %v1285_v23 = vpack.c.bf16 %v879_v22, %v876_v20 }
 0x194   :  { %1341 = vst [vmem:[%s1753_s5 + $0x28] sm:$0xff] %v1285_v23  }
 0x196   :  { %v927_v24 = vpop.f32.mrf.mxu3 }
 0x197   :  { %v1325_v25 = vpack.c.bf16 %v927_v24, %v924_v21 }
 0x199   :  { %1349 = vst [vmem:[%s1753_s5 + $0x68] sm:$0xff] %v1325_v25   ;;  %v882_v26 = vpop.f32.mrf.mxu2 }
 0x19e   :  { %v930_v27 = vpop.f32.mrf.mxu3 }
 0x1a1   :  { %v885_v28 = vpop.f32.mrf.mxu2 }
 0x1a2   :  { %v1290_v29 = vpack.c.bf16 %v885_v28, %v882_v26 }
 0x1a4   :  { %1342 = vst [vmem:[%s1753_s5 + $0x30] sm:$0xff] %v1290_v29  }
 0x1a6   :  { %v933_v30 = vpop.f32.mrf.mxu3 }
 0x1a7   :  { %v1330_v31 = vpack.c.bf16 %v933_v30, %v930_v27 }
 0x1a9   :  { %1350 = vst [vmem:[%s1753_s5 + $0x70] sm:$0xff] %v1330_v31   ;;  %v888_v32 = vpop.f32.mrf.mxu2 }
 0x1ae   :  { %v936_v33 = vpop.f32.mrf.mxu3 }
 0x1b1   :  { %v891_v34 = vpop.f32.mrf.mxu2 }
 0x1b2   :  { %v1295_v35 = vpack.c.bf16 %v891_v34, %v888_v32 }
 0x1b4   :  { %1343 = vst [vmem:[%s1753_s5 + $0x38] sm:$0xff] %v1295_v35  }
 0x1b6   :  { %v939_v36 = vpop.f32.mrf.mxu3 }
 0x1b7   :  { %v1335_v37 = vpack.c.bf16 %v939_v36, %v936_v33 }
 0x1b9   :  { %1351 = vst [vmem:[%s1753_s5 + $0x78] sm:$0xff] %v1335_v37   ;;  %v894_v38 = vpop.f32.mrf.mxu2 }
 0x1c1   :  { %v897_v39 = vpop.f32.mrf.mxu2 }
 0x1c2   :  { %v1300_v40 = vpack.c.bf16 %v897_v39, %v894_v38 }
 0x1c4   :  { %1344 = vst [vmem:[%s1753_s5 + $0x40] sm:$0xff] %v1300_v40  }
 0x1c9   :  { %v900_v41 = vpop.f32.mrf.mxu2 }
 0x1d1   :  { %v903_v42 = vpop.f32.mrf.mxu2 }
 0x1d2   :  { %v1305_v43 = vpack.c.bf16 %v903_v42, %v900_v41 }
 0x1d4   :  { %1345 = vst [vmem:[%s1753_s5 + $0x48] sm:$0xff] %v1305_v43  }
 0x1d9   :  { %v906_v44 = vpop.f32.mrf.mxu2 }
 0x1e1   :  { %v909_v45 = vpop.f32.mrf.mxu2 }
 0x1e2   :  { %v1310_v46 = vpack.c.bf16 %v909_v45, %v906_v44 }
 0x1e4   :  { %1346 = vst [vmem:[%s1753_s5 + $0x50] sm:$0xff] %v1310_v46  }
 0x1e9   :  { %v912_v47 = vpop.f32.mrf.mxu2 }
 0x1f1   :  { %v915_v48 = vpop.f32.mrf.mxu2 }
 0x1f2   :  { %v1315_v51 = vpack.c.bf16 %v915_v48, %v912_v47 }
 0x1f4   :  { %1347 = vst [vmem:[%s1753_s5 + $0x58] sm:$0xff] %v1315_v51  }
 0x1f5   :  { %1014 = vsyncpa [#allocation3], 1 }
 0x1f6   :  { %1015 = vsyncpa [#allocation5], 1 }
 0x1f7   :  { %1016 = vsyncpa [#allocation8], 1 }

</bundles_post_ra>
